<compile_context>
chip_gen: v5e
topology: v5e:2x2
jax: 0.10.0
libtpu: 0.0.40
codegen_flags: <defaults>
</compile_context>

<pallas_src>
import functools

import numpy as np
import jax
import jax.numpy as jnp
from jax import lax
from jax.experimental import pallas as pl
from jax.experimental.pallas import tpu as pltpu


def _cdiv(a, b):
    return -(-a // b)


def _round_up(a, b):
    return _cdiv(a, b) * b


def _tpu_config():
    """Best-effort (vmem_capacity_bytes, num_tensorcores). Conservative fallback."""
    vmem_bytes = 64 * 1024 * 1024     # v7x-like (most restrictive) default
    num_cores = 1
    try:
        info = pltpu.get_tpu_info()
        vmem_bytes = int(getattr(info, "vmem_capacity_bytes", vmem_bytes))
        for attr in ("num_cores", "core_count", "num_tensorcores",
                     "tensorcore_count", "num_cores_per_chip"):
            val = getattr(info, attr, None)
            if val:
                num_cores = int(val)
                break
    except Exception:
        pass
    return vmem_bytes, num_cores


def _mi_hist_kernel(yt_ref, yp_ref, *rest, preterm, max_clip, minval, maxval,
                    num_bins, has_mask):
    if has_mask:
        mask_ref, out_ref = rest
    else:
        (out_ref,) = rest
        mask_ref = None

    n = pl.program_id(1)

    @pl.when(n == 0)
    def _init():
        out_ref[...] = jnp.zeros_like(out_ref)

    B, TN = yt_ref.shape

    # Bin centers built in-kernel (affine linspace): (1, num_bins, 1); bins on
    # the sublane axis so the Gaussian windowing is pure VPU/EUP work with
    # voxels dense on the 128-lane axis.
    bin_step = (maxval - minval) / (num_bins - 1)
    centers = (minval + bin_step *
               lax.broadcasted_iota(jnp.int32, (1, num_bins, 1), 1)
               .astype(jnp.float32))

    def windows(y):
        y = jnp.clip(y * 0.5 + 0.5, 0.0, max_clip)          # (B, TN)
        d = y[:, None, :] - centers                          # (B, nb, TN)
        return jnp.exp(d * d * (-preterm))                   # un-normalized weights

    wa = windows(yt_ref[...])                                # (B, nb, TN)
    wb = windows(yp_ref[...])                                # (B, nb, TN)
    sa = jnp.sum(wa, axis=1, keepdims=True)                  # (B, 1, TN)
    sb = jnp.sum(wb, axis=1, keepdims=True)                  # (B, 1, TN)

    # Both per-voxel normalizers commute through the contraction; fold them
    # (and the optional padded-voxel mask) into one (B,1,TN) scale on the RHS.
    scale = pl.reciprocal(sa, approx=True) * pl.reciprocal(sb, approx=True)
    if has_mask:
        scale = scale * mask_ref[...][:, None, :]            # (1,1,TN) broadcast

    ia = wa.astype(jnp.bfloat16)                             # (B, nb, TN)
    ib = (wb * scale).astype(jnp.bfloat16)                   # (B, nb, TN)

    # Joint histogram: contract the voxel (lane) axis on the MXU with f32
    # accumulation; accumulate into the VMEM-resident output block.
    pab = lax.dot_general(
        ia, ib,
        dimension_numbers=(((2,), (2,)), ((0,), (0,))),
        preferred_element_type=jnp.float32)                  # (B, nb, nb)

    out_ref[...] += pab[None]


def mutual_information_loss(y_true, y_pred, *, sigma_ratio=1.0,
                            minval=0.0, maxval=1.0, num_bins=32):
    """forward(y_true, y_pred) = -mi(y_true, y_pred), matching the PyTorch module."""
    B = y_true.shape[0]
    yt = y_true.reshape(B, -1).astype(jnp.float32)
    yp = y_pred.reshape(B, -1).astype(jnp.float32)
    N = yt.shape[1]

    # Deterministic "parameters" from __init__
    bin_centers = np.linspace(minval, maxval, num=num_bins)
    sigma = float(np.mean(np.diff(bin_centers))) * sigma_ratio
    preterm = 1.0 / (2.0 * sigma ** 2)

    LANE = 128
    vmem_bytes, num_cores = _tpu_config()
    if vmem_bytes >= 96 * 1024 * 1024 and num_cores <= 1:
        # v5e / v6e: 128 MiB physical VMEM, single TensorCore.
        budget, vmem_limit, tn_hard_cap = 44 * 1024 * 1024, 64 * 1024 * 1024, 32768
    else:
        # v7x (64 MiB / TC) or unknown: stay conservative.
        budget, vmem_limit, tn_hard_cap = 24 * 1024 * 1024, 32 * 1024 * 1024, 16384

    # Rough per-voxel live-bytes of the dominant (B, nb, TN) temporaries
    # (wa/wb f32 + bf16 casts + one transient).
    bytes_per_voxel = B * num_bins * 20 + B * 16
    tn_cap = max(LANE, min(tn_hard_cap, (budget // bytes_per_voxel) // LANE * LANE))
    TN = int(min(tn_cap, _round_up(N, LANE)))

    steps_total = _cdiv(N, TN)
    # Chunk axis only when there are >= 2 TensorCores to put it on.
    C = 2 if (num_cores >= 2 and steps_total >= 2) else 1
    steps = _cdiv(steps_total, C)
    N_pad = C * steps * TN
    has_mask = (N_pad != N)

    if has_mask:
        pad = N_pad - N
        yt = jnp.pad(yt, ((0, 0), (0, pad)))
        yp = jnp.pad(yp, ((0, 0), (0, pad)))

    data_spec = pl.BlockSpec((B, TN), lambda c, n: (0, c * steps + n))
    inputs = [yt, yp]
    in_specs = [data_spec, data_spec]
    if has_mask:
        mask = (jnp.arange(N_pad, dtype=jnp.int32) < N).astype(jnp.float32)
        inputs.append(mask.reshape(1, N_pad))
        in_specs.append(pl.BlockSpec((1, TN), lambda c, n: (0, c * steps + n)))

    kernel = functools.partial(
        _mi_hist_kernel,
        preterm=float(preterm), max_clip=float(maxval),
        minval=float(minval), maxval=float(maxval),
        num_bins=num_bins, has_mask=has_mask)

    use_core_parallel = (C >= 2 and num_cores >= 2)
    dim_sems = (pltpu.CORE_PARALLEL if use_core_parallel else pltpu.ARBITRARY,
                pltpu.ARBITRARY)

    hist = pl.pallas_call(
        kernel,
        out_shape=jax.ShapeDtypeStruct((C, B, num_bins, num_bins), jnp.float32),
        grid_spec=pltpu.PrefetchScalarGridSpec(
            num_scalar_prefetch=0,
            grid=(C, steps),
            in_specs=in_specs,
            out_specs=pl.BlockSpec((1, B, num_bins, num_bins),
                                   lambda c, n: (c, 0, 0, 0)),
        ),
        compiler_params=pltpu.CompilerParams(
            dimension_semantics=dim_sems,
            vmem_limit_bytes=vmem_limit),
    )(*inputs)

    # Tiny epilogue (O(B*32*32)) in plain JAX: combine chunk partials, derive
    # the marginals from pab, apply the MI log-term + batch mean; negative
    # sign matches forward().
    pab = jnp.sum(hist, axis=0) / float(N)                   # (B, nb, nb)
    pa = jnp.sum(pab, axis=2, keepdims=True)                 # (B, nb, 1)
    pb = jnp.sum(pab, axis=1, keepdims=True)                 # (B, 1, nb)
    papb = pa * pb + 1e-6
    mi = jnp.sum(pab * jnp.log(pab / papb + 1e-6), axis=(1, 2))
    return -jnp.mean(mi)


def _reference_loss(y_true, y_pred, *, sigma_ratio=1.0,
                    minval=0.0, maxval=1.0, num_bins=32):
    """Plain-JAX transcription of the PyTorch forward, for validation."""
    bin_centers = np.linspace(minval, maxval, num=num_bins)
    sigma = float(np.mean(np.diff(bin_centers))) * sigma_ratio
    preterm = 1.0 / (2.0 * sigma ** 2)
    B = y_true.shape[0]
    yt = jnp.clip(y_true.reshape(B, -1) / 2 + 0.5, 0.0, maxval)[..., None]
    yp = jnp.clip(y_pred.reshape(B, -1) / 2 + 0.5, 0.0, maxval)[..., None]
    vbc = jnp.asarray(bin_centers, jnp.float32).reshape(1, 1, num_bins)
    Ia = jnp.exp(-preterm * (yt - vbc) ** 2)
    Ia = Ia / jnp.sum(Ia, axis=-1, keepdims=True)
    Ib = jnp.exp(-preterm * (yp - vbc) ** 2)
    Ib = Ib / jnp.sum(Ib, axis=-1, keepdims=True)
    N = yt.shape[1]
    pab = jnp.einsum('bni,bnj->bij', Ia, Ib) / N
    pa = jnp.mean(Ia, axis=1, keepdims=True)
    pb = jnp.mean(Ib, axis=1, keepdims=True)
    papb = jnp.einsum('bqi,bqj->bij', pa, pb) + 1e-6
    mi = jnp.sum(pab * jnp.log(pab / papb + 1e-6), axis=(1, 2))
    return -jnp.mean(mi)


if __name__ == "__main__":
    key = jax.random.PRNGKey(0)
    k1, k2, k3, k4, k5, k6 = jax.random.split(key, 6)

    # Case 1: small shape from the module spec — single voxel tile, no padding.
    B, Cc, H, W = 2, 4, 16, 16
    y_true = jax.random.normal(k1, (B, Cc, H, W), dtype=jnp.float32)
    y_pred = y_true + 0.1 * jax.random.normal(k2, (B, Cc, H, W), dtype=jnp.float32)
    loss = jax.block_until_ready(mutual_information_loss(y_true, y_pred))
    ref = jax.block_until_ready(_reference_loss(y_true, y_pred))
    np.testing.assert_allclose(np.asarray(loss), np.asarray(ref),
                               rtol=2e-2, atol=5e-3)

    # Case 2: N = 7500 voxels (not a multiple of 128) — exercises the
    # pad-to-lane + mask-input path on every generation.
    y_true2 = jax.random.normal(k3, (2, 3, 50, 50), dtype=jnp.float32)
    y_pred2 = y_true2 + 0.2 * jax.random.normal(k4, (2, 3, 50, 50), dtype=jnp.float32)
    loss2 = jax.block_until_ready(mutual_information_loss(y_true2, y_pred2))
    ref2 = jax.block_until_ready(_reference_loss(y_true2, y_pred2))
    np.testing.assert_allclose(np.asarray(loss2), np.asarray(ref2),
                               rtol=2e-2, atol=5e-3)

    # Case 3: N = 36864 voxels — exercises the multi-step voxel reduction
    # (accumulation into the resident output block) plus padding/masking.
    y_true3 = jax.random.normal(k5, (2, 4, 96, 96), dtype=jnp.float32)
    y_pred3 = y_true3 + 0.2 * jax.random.normal(k6, (2, 4, 96, 96), dtype=jnp.float32)
    loss3 = jax.block_until_ready(mutual_information_loss(y_true3, y_pred3))
    ref3 = jax.block_until_ready(_reference_loss(y_true3, y_pred3))
    np.testing.assert_allclose(np.asarray(loss3), np.asarray(ref3),
                               rtol=2e-2, atol=5e-3)

    print("KERNEL_OK")
</pallas_src>

<mosaic_0001>
module attributes {stable_mosaic.version = 11 : i64} {
  func.func @_mi_hist_kernel(%arg0: i32, %arg1: i32, %arg2: memref<2x1024xf32, #tpu.memory_space<vmem>>, %arg3: memref<2x1024xf32, #tpu.memory_space<vmem>>, %arg4: memref<1x2x32x32xf32, #tpu.memory_space<vmem>>) attributes {dimension_semantics = [#tpu.dimension_semantics<arbitrary>, #tpu.dimension_semantics<arbitrary>], iteration_bounds = array<i64: 1, 1>, scalar_prefetch = 0 : i64, scratch_operands = 0 : i64, tpu.core_type = #tpu.core_type<tc>, window_params = [{transform_indices = @transform_0, window_bounds = array<i64: 2, 1024>}, {transform_indices = @transform_1, window_bounds = array<i64: 2, 1024>}, {transform_indices = @transform_2, window_bounds = array<i64: 1, 2, 32, 32>}]} {
    %c0_i32 = arith.constant 0 : i32
    %0 = arith.cmpi eq, %arg1, %c0_i32 : i32
    %1 = arith.extui %0 : i1 to i32
    %c0_i32_0 = arith.constant 0 : i32
    %2 = arith.cmpi ne, %1, %c0_i32_0 : i32
    scf.if %2 {
      %cst_26 = arith.constant 0.000000e+00 : f32
      %59 = vector.broadcast %cst_26 : f32 to vector<1x2x32x32xf32>
      %c0_27 = arith.constant 0 : index
      %c0_28 = arith.constant 0 : index
      %c0_29 = arith.constant 0 : index
      %c0_30 = arith.constant 0 : index
      %60 = vector.load %arg4[%c0_27, %c0_28, %c0_29, %c0_30] : memref<1x2x32x32xf32, #tpu.memory_space<vmem>>, vector<1x2x32x32xf32>
      tpu.vector_store %arg4[%c0_27, %c0_28, %c0_29, %c0_30], %59 {strides = array<i32>} : memref<1x2x32x32xf32, #tpu.memory_space<vmem>>, vector<1x2x32x32xf32>,
    } else {
    }
    %3 = tpu.iota {dimensions = array<i32: 1>} : vector<1x32x1xi32>
    %4 = arith.sitofp %3 : vector<1x32x1xi32> to vector<1x32x1xf32>
    %cst = arith.constant 0.0322580636 : f32
    %5 = vector.broadcast %cst : f32 to vector<1x32x1xf32>
    %6 = arith.mulf %5, %4 : vector<1x32x1xf32>
    %cst_1 = arith.constant 0.000000e+00 : f32
    %7 = vector.broadcast %cst_1 : f32 to vector<1x32x1xf32>
    %8 = arith.addf %7, %6 : vector<1x32x1xf32>
    %c0 = arith.constant 0 : index
    %c0_2 = arith.constant 0 : index
    %9 = vector.load %arg2[%c0, %c0_2] : memref<2x1024xf32, #tpu.memory_space<vmem>>, vector<2x1024xf32>
    %cst_3 = arith.constant 5.000000e-01 : f32
    %10 = vector.broadcast %cst_3 : f32 to vector<2x1024xf32>
    %11 = arith.mulf %9, %10 : vector<2x1024xf32>
    %cst_4 = arith.constant 5.000000e-01 : f32
    %12 = vector.broadcast %cst_4 : f32 to vector<2x1024xf32>
    %13 = arith.addf %11, %12 : vector<2x1024xf32>
    %cst_5 = arith.constant 0.000000e+00 : f32
    %cst_6 = arith.constant 1.000000e+00 : f32
    %14 = vector.broadcast %cst_5 : f32 to vector<2x1024xf32>
    %15 = arith.maximumf %14, %13 : vector<2x1024xf32>
    %16 = vector.broadcast %cst_6 : f32 to vector<2x1024xf32>
    %17 = arith.minimumf %16, %15 : vector<2x1024xf32>
    %18 = vector.shape_cast %17 : vector<2x1024xf32> to vector<2x1x1024xf32>
    %19 = vector.broadcast %18 : vector<2x1x1024xf32> to vector<2x32x1024xf32>
    %20 = vector.broadcast %8 : vector<1x32x1xf32> to vector<2x32x1024xf32>
    %21 = arith.subf %19, %20 : vector<2x32x1024xf32>
    %22 = arith.mulf %21, %21 : vector<2x32x1024xf32>
    %cst_7 = arith.constant -4.805000e+02 : f32
    %23 = vector.broadcast %cst_7 : f32 to vector<2x32x1024xf32>
    %24 = arith.mulf %22, %23 : vector<2x32x1024xf32>
    %25 = math.exp %24 : vector<2x32x1024xf32>
    %c0_8 = arith.constant 0 : index
    %c0_9 = arith.constant 0 : index
    %26 = vector.load %arg3[%c0_8, %c0_9] : memref<2x1024xf32, #tpu.memory_space<vmem>>, vector<2x1024xf32>
    %cst_10 = arith.constant 5.000000e-01 : f32
    %27 = vector.broadcast %cst_10 : f32 to vector<2x1024xf32>
    %28 = arith.mulf %26, %27 : vector<2x1024xf32>
    %cst_11 = arith.constant 5.000000e-01 : f32
    %29 = vector.broadcast %cst_11 : f32 to vector<2x1024xf32>
    %30 = arith.addf %28, %29 : vector<2x1024xf32>
    %cst_12 = arith.constant 0.000000e+00 : f32
    %cst_13 = arith.constant 1.000000e+00 : f32
    %31 = vector.broadcast %cst_12 : f32 to vector<2x1024xf32>
    %32 = arith.maximumf %31, %30 : vector<2x1024xf32>
    %33 = vector.broadcast %cst_13 : f32 to vector<2x1024xf32>
    %34 = arith.minimumf %33, %32 : vector<2x1024xf32>
    %35 = vector.shape_cast %34 : vector<2x1024xf32> to vector<2x1x1024xf32>
    %36 = vector.broadcast %35 : vector<2x1x1024xf32> to vector<2x32x1024xf32>
    %37 = vector.broadcast %8 : vector<1x32x1xf32> to vector<2x32x1024xf32>
    %38 = arith.subf %36, %37 : vector<2x32x1024xf32>
    %39 = arith.mulf %38, %38 : vector<2x32x1024xf32>
    %cst_14 = arith.constant -4.805000e+02 : f32
    %40 = vector.broadcast %cst_14 : f32 to vector<2x32x1024xf32>
    %41 = arith.mulf %39, %40 : vector<2x32x1024xf32>
    %42 = math.exp %41 : vector<2x32x1024xf32>
    %cst_15 = arith.constant dense<0.000000e+00> : vector<2x1024xf32>
    %43 = vector.multi_reduction <add>, %25, %cst_15 [1] : vector<2x32x1024xf32> to vector<2x1024xf32>
    %44 = vector.shape_cast %43 : vector<2x1024xf32> to vector<2x1x1024xf32>
    %cst_16 = arith.constant dense<0.000000e+00> : vector<2x1024xf32>
    %45 = vector.multi_reduction <add>, %42, %cst_16 [1] : vector<2x32x1024xf32> to vector<2x1024xf32>
    %46 = vector.shape_cast %45 : vector<2x1024xf32> to vector<2x1x1024xf32>
    %47 = tpu.reciprocal %44 {approx = true} : vector<2x1x1024xf32> -> vector<2x1x1024xf32>
    %48 = tpu.reciprocal %46 {approx = true} : vector<2x1x1024xf32> -> vector<2x1x1024xf32>
    %49 = arith.mulf %47, %48 : vector<2x1x1024xf32>
    %50 = arith.truncf %25 : vector<2x32x1024xf32> to vector<2x32x1024xbf16>
    %51 = vector.broadcast %49 : vector<2x1x1024xf32> to vector<2x32x1024xf32>
    %52 = arith.mulf %42, %51 : vector<2x32x1024xf32>
    %53 = arith.truncf %52 : vector<2x32x1024xf32> to vector<2x32x1024xbf16>
    %cst_17 = arith.constant dense<0.000000e+00> : vector<2x32x32xf32>
    %54 = tpu.matmul %50, %53, %cst_17 {dimension_numbers = #tpu.dot_dimension_numbers<[2], [2], [1], [1], [0, 0, 0, 1, 1, 1], [0], [0]>} : vector<2x32x1024xbf16>, vector<2x32x1024xbf16>, vector<2x32x32xf32> -> vector<2x32x32xf32>
    %c0_18 = arith.constant 0 : index
    %c0_19 = arith.constant 0 : index
    %c0_20 = arith.constant 0 : index
    %c0_21 = arith.constant 0 : index
    %55 = vector.load %arg4[%c0_18, %c0_19, %c0_20, %c0_21] : memref<1x2x32x32xf32, #tpu.memory_space<vmem>>, vector<1x2x32x32xf32>
    %56 = vector.shape_cast %54 : vector<2x32x32xf32> to vector<1x2x32x32xf32>
    %57 = arith.addf %55, %56 : vector<1x2x32x32xf32>
    %c0_22 = arith.constant 0 : index
    %c0_23 = arith.constant 0 : index
    %c0_24 = arith.constant 0 : index
    %c0_25 = arith.constant 0 : index
    %58 = vector.load %arg4[%c0_22, %c0_23, %c0_24, %c0_25] : memref<1x2x32x32xf32, #tpu.memory_space<vmem>>, vector<1x2x32x32xf32>
    tpu.vector_store %arg4[%c0_22, %c0_23, %c0_24, %c0_25], %57 {strides = array<i32>} : memref<1x2x32x32xf32, #tpu.memory_space<vmem>>, vector<1x2x32x32xf32>,
    return
  }
  func.func @transform_0(%arg0: i32, %arg1: i32) -> (i32, i32) {
    %c1_i32 = arith.constant 1 : i32
    %0 = arith.muli %arg0, %c1_i32 : i32
    %1 = arith.addi %0, %arg1 : i32
    %c0_i32 = arith.constant 0 : i32
    %c0_i32_0 = arith.constant 0 : i32
    return %c0_i32, %1 : i32, i32
  }
  func.func @transform_1(%arg0: i32, %arg1: i32) -> (i32, i32) {
    %c1_i32 = arith.constant 1 : i32
    %0 = arith.muli %arg0, %c1_i32 : i32
    %1 = arith.addi %0, %arg1 : i32
    %c0_i32 = arith.constant 0 : i32
    %c0_i32_0 = arith.constant 0 : i32
    return %c0_i32, %1 : i32, i32
  }
  func.func @transform_2(%arg0: i32, %arg1: i32) -> (i32, i32, i32, i32) {
    %c0_i32 = arith.constant 0 : i32
    %c0_i32_0 = arith.constant 0 : i32
    %c0_i32_1 = arith.constant 0 : i32
    %c0_i32_2 = arith.constant 0 : i32
    return %arg0, %c0_i32, %c0_i32_0, %c0_i32_1 : i32, i32, i32, i32
  }
}

</mosaic_0001>

<bundles_post_ra>
// kernel: tpu_custom_call.1
= control target key start
LH: loop header
LB: loop body
LE: loop exit
PB: predicated region body
PF: predicated region fallthrough
CT: control target
= control target key end

     0   :  { %7 = vsyncpa [#allocation3], 0  ;;  %s3371_s0 = inlined_call_operand.hbm [shape: f32[2,1024], index: 0, kind: input, shape index: {}]   ;;  %s3372_s1 = inlined_call_operand.hbm [shape: f32[2,1024], index: 1, kind: input, shape index: {}]   ;;  %s3373_s2 = inlined_call_operand.hbm [shape: f32[1,2,32,32], index: 2, kind: output, shape index: {}]  }
   0x1   :  { %8 = vsyncpa [#allocation6], 0 }
   0x2   :  { %9 = vsyncpa [#allocation4], 0  ;;  %s19_s11 = sshll.u32 %s3371_s0, 4  ;;  %s2406_s12 = smov [#allocation2]   ;;  %s20_s11 = int_to_ptr.hbm [resolvable:$true] %s19_s11 }
   0x3   :  { %s21_s13 = sshll.u32 %s2406_s12, 4  ;;  %s34_s16 = sshll.u32 %s3372_s1, 4  ;;  %s22_s13 = int_to_ptr.vmem [resolvable:$true] %s21_s13  ;;  %s35_s16 = int_to_ptr.hbm [resolvable:$true] %s34_s16 }
   0x4   :  { %24 = dma.hbm_to_vmem [thread:$0]  %s20_s11, 256, %s22_s13, [#allocation3]  }
   0x5   :  { %s2407_s17 = smov [#allocation5]  }
   0x6   :  { %s36_s18 = sshll.u32 %s2407_s17, 4  ;;  %s37_s18 = int_to_ptr.vmem [resolvable:$true] %s36_s18 }
   0x7   :  { %39 = dma.hbm_to_vmem [thread:$0]  %s35_s16, 256, %s37_s18, [#allocation6]  }
   0x8   :  { %2400 = dma.done.wait [#allocation3], 256  }
   0x9   :  { %2401 = vsyncadd [#allocation3], 4294967040 }
   0xa   :  { %2402 = dma.done.wait [#allocation6], 256  }
   0xb   :  { %2403 = vsyncadd [#allocation6], 4294967040  ;;  %v66_v0 = vlaneseq  ;;  %v83_v2 = vld [vmem:[#allocation2] sm:$0xff]  ;;  %v84_v3 = vld [vmem:[#allocation2 + $0x8] sm:$0xff]  ;;  %vm102_vm0 = vcmask 1040384   ;;  %vm104_vm1 = vcmask 1042434  }
   0xc   :  { %v483_v4 = vld [vmem:[#allocation5] sm:$0xff]  ;;  %v85_v7 = vmul.f32 0.5, %v83_v2  ;;  %v86_v8 = vmul.f32 0.5, %v84_v3  ;;  %vm106_vm2 = vcmask 1041408   ;;  %vm108_vm3 = vcmask 1044484   ;;  %v484_v9 = vld [vmem:[#allocation5 + $0x8] sm:$0xff] }
   0xd   :  { %v67_v1 = vshrl.u32 %v66_v0, 7  ;;  %vm110_vm4 = vcmask 1046534   ;;  %v485_v10 = vmul.f32 0.5, %v483_v4  ;;  %vm112_vm5 = vcmask 1045508   ;;  %s2409_s0 = smov [#allocation7]   ;;  %s1988_s21 = sshll.u32 %s3373_s2, 4  ;;  %s1989_s21 = int_to_ptr.hbm [resolvable:$true] %s1988_s21 }
   0xe   :  { %vm116_vm6 = vcmask 1041409   ;;  %vm118_vm7 = vcmask 1043459   ;;  %vm120_vm8 = vcmask 1042433   ;;  %v486_v11 = vmul.f32 0.5, %v484_v9  ;;  %s1986_s1 = sshll.u32 %s2409_s0, 4  ;;  %s2410_s22 = smov 128   ;;  %s1987_s1 = int_to_ptr.vmem [resolvable:$true] %s1986_s1 }
   0xf   :  { %v68_v5 = vadd.s32 8, %v67_v1  ;;  %v69_v6 = vadd.s32 16, %v67_v1  ;;  %v71_v12 = vcvt.s32.f32 %v67_v1  ;;  %v87_v13 = vadd.f32 0.5, %v85_v7  ;;  %s2411_s23 = smov 8  }
  0x10   :  { %v88_v14 = vadd.f32 0.5, %v86_v8  ;;  %vm114_vm9 = vcmask 1043456   ;;  %v487_v15 = vadd.f32 0.5, %v485_v10  ;;  %v70_v16 = vadd.s32 24, %v67_v1 }
  0x11   :  { %v72_v17 = vcvt.s32.f32 %v68_v5  ;;  %v73_v18 = vcvt.s32.f32 %v69_v6  ;;  %v488_v19 = vadd.f32 0.5, %v486_v11  ;;  %v89_v20 = vmax.f32 %v87_v13, 0.0 }
  0x12   :  { %v90_v21 = vmax.f32 %v88_v14, 0.0  ;;  %vm122_vm10 = vcmask 1045509   ;;  %v489_v22 = vmax.f32 %v487_v15, 0.0  ;;  %vm124_vm11 = vcmask 1046528  }
  0x13   :  { %vm126_vm12 = vcmask 1046533   ;;  %vm128_vm13 = vcmask 1044481   ;;  %v490_v23 = vmax.f32 %v488_v19, 0.0  ;;  %v2433_v24 = vmul.f32 0.032258064, %v71_v12 }
  0x14   :  { %v91_v25 = vmin.f32 %v89_v20, 1.0  ;;  %v92_v26 = vmin.f32 %v90_v21, 1.0  ;;  %v2435_v27 = vmin.f32 %v489_v22, 1.0  ;;  %v74_v28 = vcvt.s32.f32 %v70_v16 }
  0x15   :  { %v2437_v29 = vmul.f32 0.032258064, %v72_v17  ;;  %v2439_v30 = vmul.f32 0.032258064, %v73_v18  ;;  %v2441_v31 = vmin.f32 %v490_v23, 1.0  ;;  %vm57_vm14 = vcmask 261120  }
  0x16   :  { %v95_v32 = vrot.slane %v91_v25, 1  ;;  %v96_v33 = vrot.slane %v91_v25, 2  ;;  %v97_v34 = vrot.slane %v91_v25, 3  ;;  %v98_v35 = vrot.slane %v92_v26, 4 }
  0x17   :  { %v99_v36 = vrot.slane %v92_v26, 5  ;;  %v100_v37 = vrot.slane %v92_v26, 6  ;;  %v101_v38 = vrot.slane %v92_v26, 7  ;;  %v495_v39 = vrot.slane %v2435_v27, 1 }
  0x18   :  { %v103_v40 = vsel %vm102_vm0, %v91_v25, %v95_v32  ;;  %v105_v41 = vsel %vm104_vm1, %v96_v33, %v97_v34  ;;  %v117_v42 = vsel %vm116_vm6, %v91_v25, %v95_v32  ;;  %v119_v43 = vsel %vm118_vm7, %v96_v33, %v97_v34 }
  0x19   :  { %v107_v44 = vsel %vm106_vm2, %v103_v40, %v105_v41  ;;  %v109_v45 = vsel %vm108_vm3, %v98_v35, %v99_v36  ;;  %v111_v46 = vsel %vm110_vm4, %v100_v37, %v101_v38  ;;  %v121_v47 = vsel %vm120_vm8, %v117_v42, %v119_v43 }
  0x1a   :  { %v2452_v48 = vmul.f32 0.032258064, %v74_v28  ;;  %v113_v49 = vsel %vm112_vm5, %v109_v45, %v111_v46  ;;  %v123_v50 = vsel %vm122_vm10, %v98_v35, %v99_v36  ;;  %v125_v51 = vsel %vm124_vm11, %v101_v38, %v100_v37 }
  0x1b   :  { %v2458_v52 = vsel %vm114_vm9, %v107_v44, %v113_v49  ;;  %v127_v53 = vsel %vm126_vm12, %v123_v50, %v125_v51  ;;  %v496_v54 = vrot.slane %v2435_v27, 2  ;;  %v497_v55 = vrot.slane %v2435_v27, 3 }
  0x1c   :  { %v129_v56 = vsel %vm128_vm13, %v121_v47, %v127_v53  ;;  %v131_v57 = vperm.slane %v2458_v52, 0  ;;  %v132_v58 = vperm.slane %v2458_v52, 1  ;;  %v498_v59 = vrot.slane %v2441_v31, 4 }
  0x1d   :  { %v499_v60 = vrot.slane %v2441_v31, 5  ;;  %v500_v61 = vrot.slane %v2441_v31, 6  ;;  %v501_v62 = vrot.slane %v2441_v31, 7  ;;  %v502_v63 = vsel %vm102_vm0, %v2435_v27, %v495_v39 }
  0x1e   :  { %v163_v0 = vsub.f32 %v131_v57, %v2433_v24  ;;  %v164_v1 = vsub.f32 %v132_v58, %v2433_v24  ;;  %v171_v2 = vsub.f32 %v131_v57, %v2437_v29  ;;  %v172_v3 = vsub.f32 %v132_v58, %v2437_v29 }
  0x1f   :  { %v179_v4 = vsub.f32 %v131_v57, %v2439_v30  ;;  %v180_v5 = vsub.f32 %v132_v58, %v2439_v30  ;;  %v187_v6 = vsub.f32 %v131_v57, %v2452_v48  ;;  %v188_v7 = vsub.f32 %v132_v58, %v2452_v48 }
  0x20   :  { %v227_v8 = vmul.f32 %v163_v0, %v163_v0  ;;  %v228_v9 = vmul.f32 %v164_v1, %v164_v1  ;;  %v235_v10 = vmul.f32 %v171_v2, %v171_v2  ;;  %v236_v11 = vmul.f32 %v172_v3, %v172_v3 }
  0x21   :  { %v243_v12 = vmul.f32 %v179_v4, %v179_v4  ;;  %v244_v13 = vmul.f32 %v180_v5, %v180_v5  ;;  %v251_v14 = vmul.f32 %v187_v6, %v187_v6  ;;  %v252_v15 = vmul.f32 %v188_v7, %v188_v7 }
  0x22   :  { %v291_v16 = vmul.f32 -480.5, %v227_v8  ;;  %v292_v17 = vmul.f32 -480.5, %v228_v9  ;;  %v299_v18 = vmul.f32 -480.5, %v235_v10  ;;  %v300_v19 = vmul.f32 -480.5, %v236_v11 }
  0x23   :  { %v307_v20 = vmul.f32 -480.5, %v243_v12  ;;  %v308_v21 = vmul.f32 -480.5, %v244_v13  ;;  %v315_v22 = vmul.f32 -480.5, %v251_v14  ;;  %v316_v23 = vmul.f32 -480.5, %v252_v15 }
  0x24   :  { %v355_v25 = vmul.f32 1.442695, %v291_v16  ;;  %v357_v26 = vmul.f32 1.442695, %v292_v17  ;;  %v371_v28 = vmul.f32 1.442695, %v299_v18  ;;  %v503_v31 = vsel %vm104_vm1, %v496_v54, %v497_v55 }
  0x25   :  { %v373_v32 = vmul.f32 1.442695, %v300_v19  ;;  %v387_v33 = vmul.f32 1.442695, %v307_v20  ;;  %v389_v34 = vmul.f32 1.442695, %v308_v21  ;;  %v504_v35 = vsel %vm106_vm2, %v502_v63, %v503_v31 }
  0x26   :  { %2008 = vpow2.f32 %v355_v25  ;;  %v403_v36 = vmul.f32 1.442695, %v315_v22  ;;  %v405_v37 = vmul.f32 1.442695, %v316_v23  ;;  %v505_v38 = vsel %vm108_vm3, %v498_v59, %v499_v60 }
  0x27   :  { %2010 = vpow2.f32 %v357_v26  ;;  %v506_v40 = vsel %vm110_vm4, %v500_v61, %v501_v62  ;;  %v509_v41 = vsel %vm116_vm6, %v2435_v27, %v495_v39  ;;  %v510_v42 = vsel %vm118_vm7, %v496_v54, %v497_v55 }
  0x28   :  { %2012 = vpow2.f32 %v371_v28  ;;  %v507_v43 = vsel %vm112_vm5, %v505_v38, %v506_v40  ;;  %v511_v44 = vsel %vm120_vm8, %v509_v41, %v510_v42  ;;  %v512_v45 = vsel %vm122_vm10, %v498_v59, %v499_v60 }
  0x29   :  { %2014 = vpow2.f32 %v373_v32  ;;  %v2495_v46 = vsel %vm114_vm9, %v504_v35, %v507_v43  ;;  %v513_v47 = vsel %vm124_vm11, %v501_v62, %v500_v61  ;;  %v2499_v49 = vperm.slane %v2458_v52, 2 }
  0x2a   :  { %2016 = vpow2.f32 %v387_v33  ;;  %v514_v27 = vsel %vm126_vm12, %v512_v45, %v513_v47  ;;  %v517_v39 = vperm.slane %v2495_v46, 0  ;;  %v518_v50 = vperm.slane %v2495_v46, 1 }
  0x2b   :  { %v2504_v51 = vrot.slane %v129_v56, 1  ;;  %2018 = vpow2.f32 %v389_v34  ;;  %v2507_v53 = vsel %vm128_vm13, %v511_v44, %v514_v27  ;;  %v134_v54 = vperm.slane %v2458_v52, 3 }
  0x2c   :  { %v2510_v55 = vpop.eup %2008  ;;  %2020 = vpow2.f32 %v403_v36  ;;  %v549_v57 = vsub.f32 %v517_v39, %v2433_v24  ;;  %v550_v58 = vsub.f32 %v518_v50, %v2433_v24  ;;  %v165_v59 = vsub.f32 %v2499_v49, %v2433_v24 }
  0x2d   :  { %v2516_v60 = vpop.eup %2010  ;;  %2022 = vpow2.f32 %v405_v37  ;;  %v557_v56 = vsub.f32 %v517_v39, %v2437_v29  ;;  %v558_v61 = vsub.f32 %v518_v50, %v2437_v29  ;;  %v565_v62 = vsub.f32 %v517_v39, %v2439_v30 }
  0x2e   :  { %v2521_v63 = vpop.eup %2012  ;;  %v566_v0 = vsub.f32 %v518_v50, %v2439_v30  ;;  %v573_v1 = vsub.f32 %v517_v39, %v2452_v48  ;;  %v574_v2 = vsub.f32 %v518_v50, %v2452_v48  ;;  %v613_v3 = vmul.f32 %v549_v57, %v549_v57 }
  0x2f   :  { %v2526_v4 = vpop.eup %2014  ;;  %v614_v5 = vmul.f32 %v550_v58, %v550_v58  ;;  %v621_v6 = vmul.f32 %v557_v56, %v557_v56  ;;  %v622_v7 = vmul.f32 %v558_v61, %v558_v61  ;;  %v629_v8 = vmul.f32 %v565_v62, %v565_v62 }
  0x30   :  { %v2528_v9 = vpop.eup %2016  ;;  %v630_v10 = vmul.f32 %v566_v0, %v566_v0  ;;  %v637_v11 = vmul.f32 %v573_v1, %v573_v1  ;;  %v638_v12 = vmul.f32 %v574_v2, %v574_v2  ;;  %v677_v13 = vmul.f32 -480.5, %v613_v3 }
  0x31   :  { %v2530_v14 = vpop.eup %2018  ;;  %v678_v15 = vmul.f32 -480.5, %v614_v5  ;;  %v685_v16 = vmul.f32 -480.5, %v621_v6  ;;  %v686_v17 = vmul.f32 -480.5, %v622_v7  ;;  %v693_v18 = vmul.f32 -480.5, %v629_v8 }
  0x32   :  { %3392 = vst [vmem:[#allocation11_spill] sm:$0xff] %v2530_v14  ;;  %v2532_v19 = vpop.eup %2020  ;;  %v694_v20 = vmul.f32 -480.5, %v630_v10  ;;  %v701_v21 = vmul.f32 -480.5, %v637_v11  ;;  %v702_v22 = vmul.f32 -480.5, %v638_v12  ;;  %v741_v23 = vmul.f32 1.442695, %v677_v13 }
  0x33   :  { %3393 = vst [vmem:[#allocation12_spill] sm:$0xff] %v2532_v19  ;;  %v2534_v25 = vpop.eup %2022  ;;  %v743_v26 = vmul.f32 1.442695, %v678_v15  ;;  %v757_v28 = vmul.f32 1.442695, %v685_v16  ;;  %v869_v32 = vadd.f32 %v2521_v63, %v2510_v55  ;;  %v878_v38 = vadd.f32 %v2526_v4, %v2516_v60 }
  0x34   :  { %3394 = vst [vmem:[#allocation13_spill] sm:$0xff] %v2534_v25  ;;  %v759_v31 = vmul.f32 1.442695, %v686_v17  ;;  %2024 = vpow2.f32 %v741_v23  ;;  %v773_v33 = vmul.f32 1.442695, %v693_v18  ;;  %v166_v40 = vsub.f32 %v134_v54, %v2433_v24 }
  0x35   :  { %v775_v34 = vmul.f32 1.442695, %v694_v20  ;;  %v789_v35 = vmul.f32 1.442695, %v701_v21  ;;  %2026 = vpow2.f32 %v743_v26  ;;  %v791_v36 = vmul.f32 1.442695, %v702_v22 }
  0x36   :  { %v870_v37 = vadd.f32 %v2528_v9, %v869_v32  ;;  %2028 = vpow2.f32 %v757_v28  ;;  %v173_v41 = vsub.f32 %v2499_v49, %v2437_v29  ;;  %v174_v42 = vsub.f32 %v134_v54, %v2437_v29 }
  0x37   :  { %2030 = vpow2.f32 %v759_v31  ;;  %v879_v44 = vadd.f32 %v2530_v14, %v878_v38  ;;  %v181_v45 = vsub.f32 %v2499_v49, %v2439_v30  ;;  %v182_v47 = vsub.f32 %v134_v54, %v2439_v30 }
  0x38   :  { %v871_v43 = vadd.f32 %v2532_v19, %v870_v37  ;;  %2032 = vpow2.f32 %v773_v33  ;;  %v189_v27 = vsub.f32 %v2499_v49, %v2452_v48  ;;  %v190_v39 = vsub.f32 %v134_v54, %v2452_v48 }
  0x39   :  { %2034 = vpow2.f32 %v775_v34  ;;  %v880_v57 = vadd.f32 %v2534_v25, %v879_v44  ;;  %v229_v58 = vmul.f32 %v165_v59, %v165_v59  ;;  %v230_v61 = vmul.f32 %v166_v40, %v166_v40 }
  0x3a   :  { %v872_v50 = vrot.slane %v871_v43, 4  ;;  %v2554_v56 = vpop.eup %2024  ;;  %2036 = vpow2.f32 %v789_v35  ;;  %v237_v62 = vmul.f32 %v173_v41, %v173_v41  ;;  %v238_v0 = vmul.f32 %v174_v42, %v174_v42 }
  0x3b   :  { %v2556_v1 = vpop.eup %2026  ;;  %2038 = vpow2.f32 %v791_v36  ;;  %v881_v3 = vrot.slane %v880_v57, 4  ;;  %v245_v5 = vmul.f32 %v181_v45, %v181_v45  ;;  %v246_v54 = vmul.f32 %v182_v47, %v182_v47 }
  0x3c   :  { %v873_v2 = vadd.f32 %v872_v50, %v871_v43  ;;  %v2558_v49 = vpop.eup %2028  ;;  %v253_v6 = vmul.f32 %v189_v27, %v189_v27  ;;  %v254_v7 = vmul.f32 %v190_v39, %v190_v39  ;;  %v293_v8 = vmul.f32 -480.5, %v229_v58 }
  0x3d   :  { %v2560_v10 = vpop.eup %2030  ;;  %v882_v11 = vadd.f32 %v881_v3, %v880_v57  ;;  %v1013_v12 = vadd.f32 %v2558_v49, %v2554_v56  ;;  %v294_v13 = vmul.f32 -480.5, %v230_v61  ;;  %v301_v17 = vmul.f32 -480.5, %v237_v62 }
  0x3e   :  { %v874_v59 = vrot.slane %v873_v2, 2  ;;  %v2564_v15 = vpop.eup %2032  ;;  %v1022_v16 = vadd.f32 %v2560_v10, %v2556_v1  ;;  %v302_v18 = vmul.f32 -480.5, %v238_v0  ;;  %v309_v20 = vmul.f32 -480.5, %v245_v5 }
  0x3f   :  { %v2568_v21 = vpop.eup %2034  ;;  %v883_v23 = vrot.slane %v882_v11, 2  ;;  %v1014_v26 = vadd.f32 %v2564_v15, %v1013_v12  ;;  %v310_v28 = vmul.f32 -480.5, %v246_v54  ;;  %v317_v33 = vmul.f32 -480.5, %v253_v6 }
  0x40   :  { %v875_v22 = vadd.f32 %v874_v59, %v873_v2  ;;  %v2571_v31 = vpop.eup %2036  ;;  %v1023_v32 = vadd.f32 %v2568_v21, %v1022_v16  ;;  %v318_v34 = vmul.f32 -480.5, %v254_v7  ;;  %v359_v35 = vmul.f32 1.442695, %v293_v8 }
  0x41   :  { %v2574_v36 = vpop.eup %2038  ;;  %v884_v38 = vadd.f32 %v883_v23, %v882_v11  ;;  %v1015_v40 = vadd.f32 %v2571_v31, %v1014_v26  ;;  %v361_v41 = vmul.f32 1.442695, %v294_v13  ;;  %v375_v43 = vmul.f32 1.442695, %v301_v17 }
  0x42   :  { %v876_v37 = vrot.slane %v875_v22, 1  ;;  %v1024_v42 = vadd.f32 %v2574_v36, %v1023_v32  ;;  %2040 = vpow2.f32 %v359_v35  ;;  %v377_v44 = vmul.f32 1.442695, %v302_v18 }
  0x43   :  { %v885_v47 = vrot.slane %v884_v38, 1  ;;  %v1016_v27 = vrot.slane %v1015_v40, 4  ;;  %2042 = vpow2.f32 %v361_v41  ;;  %v2579_v39 = vrot.slane %v2507_v53, 1 }
  0x44   :  { %v877_v45 = vadd.f32 %v876_v37, %v875_v22  ;;  %v1025_v50 = vrot.slane %v1024_v42, 4  ;;  %2044 = vpow2.f32 %v375_v43  ;;  %v391_v57 = vmul.f32 1.442695, %v309_v20 }
  0x45   :  { %v886_v58 = vadd.f32 %v885_v47, %v884_v38  ;;  %v1017_v61 = vadd.f32 %v1016_v27, %v1015_v40  ;;  %v393_v62 = vmul.f32 1.442695, %v310_v28  ;;  %v407_v2 = vmul.f32 1.442695, %v317_v33 }
  0x46   :  { %2046 = vrcp.f32 %v877_v45  ;;  %v1026_v0 = vadd.f32 %v1025_v50, %v1024_v42  ;;  %v519_v3 = vperm.slane %v2495_v46, 2  ;;  %v409_v54 = vmul.f32 1.442695, %v318_v34 }
  0x47   :  { %2048 = vpow2.f32 %v377_v44  ;;  %v1018_v5 = vrot.slane %v1017_v61, 2  ;;  %v520_v6 = vperm.slane %v2495_v46, 3 }
  0x48   :  { %2050 = vrcp.f32 %v886_v58  ;;  %v2583_v7 = vpop.eup %2040  ;;  %v1027_v53 = vrot.slane %v1026_v0, 2  ;;  %v551_v8 = vsub.f32 %v519_v3, %v2433_v24  ;;  %v559_v59 = vsub.f32 %v519_v3, %v2437_v29 }
  0x49   :  { %2052 = vpow2.f32 %v391_v57  ;;  %v2587_v11 = vpop.eup %2042  ;;  %v1019_v12 = vadd.f32 %v1018_v5, %v1017_v61  ;;  %v552_v13 = vsub.f32 %v520_v6, %v2433_v24  ;;  %v560_v16 = vsub.f32 %v520_v6, %v2437_v29 }
  0x4a   :  { %2054 = vpow2.f32 %v393_v62  ;;  %v2591_v17 = vpop.eup %2044  ;;  %v1028_v18 = vadd.f32 %v1027_v53, %v1026_v0  ;;  %v567_v20 = vsub.f32 %v519_v3, %v2439_v30  ;;  %v568_v22 = vsub.f32 %v520_v6, %v2439_v30 }
  0x4b   :  { %2056 = vpow2.f32 %v407_v2  ;;  %v1020_v26 = vrot.slane %v1019_v12, 1  ;;  %v575_v28 = vsub.f32 %v519_v3, %v2452_v48  ;;  %v576_v32 = vsub.f32 %v520_v6, %v2452_v48 }
  0x4c   :  { %v2047_v23 = vpop.eup %2046  ;;  %2058 = vpow2.f32 %v409_v54  ;;  %v1029_v34 = vrot.slane %v1028_v18, 1  ;;  %v615_v35 = vmul.f32 %v551_v8, %v551_v8  ;;  %v616_v37 = vmul.f32 %v552_v13, %v552_v13 }
  0x4d   :  { %v2597_v33 = vpop.eup %2048  ;;  %v623_v38 = vmul.f32 %v559_v59, %v559_v59  ;;  %v1021_v41 = vadd.f32 %v1020_v26, %v1019_v12  ;;  %v624_v42 = vmul.f32 %v560_v16, %v560_v16  ;;  %v631_v43 = vmul.f32 %v567_v20, %v567_v20 }
  0x4e   :  { %v2051_v40 = vpop.eup %2050  ;;  %v632_v44 = vmul.f32 %v568_v22, %v568_v22  ;;  %v1030_v47 = vadd.f32 %v1029_v34, %v1028_v18  ;;  %v639_v27 = vmul.f32 %v575_v28, %v575_v28  ;;  %v640_v50 = vmul.f32 %v576_v32, %v576_v32 }
  0x4f   :  { %v2599_v45 = vpop.eup %2052  ;;  %v679_v57 = vmul.f32 -480.5, %v615_v35  ;;  %2060 = vrcp.f32 %v1021_v41  ;;  %v680_v61 = vmul.f32 -480.5, %v616_v37  ;;  %v687_v62 = vmul.f32 -480.5, %v623_v38 }
  0x50   :  { %3395 = vst [vmem:[#allocation14_spill] sm:$0xff] %v2599_v45  ;;  %v2601_v58 = vpop.eup %2054  ;;  %v688_v0 = vmul.f32 -480.5, %v624_v42  ;;  %2062 = vrcp.f32 %v1030_v47  ;;  %v695_v3 = vmul.f32 -480.5, %v631_v43  ;;  %v696_v5 = vmul.f32 -480.5, %v632_v44 }
  0x51   :  { %3396 = vst [vmem:[#allocation15_spill] sm:$0xff] %v2601_v58  ;;  %v2603_v2 = vpop.eup %2056  ;;  %v703_v54 = vmul.f32 -480.5, %v639_v27  ;;  %v704_v53 = vmul.f32 -480.5, %v640_v50  ;;  %v745_v8 = vmul.f32 1.442695, %v679_v57  ;;  %v887_v12 = vadd.f32 %v2591_v17, %v2583_v7 }
  0x52   :  { %3397 = vst [vmem:[#allocation16_spill] sm:$0xff] %v2603_v2  ;;  %v2605_v6 = vpop.eup %2058  ;;  %v747_v59 = vmul.f32 1.442695, %v680_v61  ;;  %v761_v13 = vmul.f32 1.442695, %v687_v62  ;;  %v896_v20 = vadd.f32 %v2597_v33, %v2587_v11  ;;  %v137_v35 = vperm.slane %v2458_v52, 6 }
  0x53   :  { %3398 = vst [vmem:[#allocation17_spill] sm:$0xff] %v2605_v6  ;;  %v763_v16 = vmul.f32 1.442695, %v688_v0  ;;  %v777_v18 = vmul.f32 1.442695, %v695_v3  ;;  %2064 = vpow2.f32 %v745_v8  ;;  %v888_v32 = vadd.f32 %v2599_v45, %v887_v12 }
  0x54   :  { %v779_v22 = vmul.f32 1.442695, %v696_v5  ;;  %v793_v26 = vmul.f32 1.442695, %v703_v54  ;;  %v795_v28 = vmul.f32 1.442695, %v704_v53  ;;  %2066 = vpow2.f32 %v747_v59 }
  0x55   :  { %v897_v34 = vadd.f32 %v2601_v58, %v896_v20  ;;  %v2061_v37 = vpop.eup %2060  ;;  %2068 = vpow2.f32 %v761_v13  ;;  %v138_v38 = vperm.slane %v2458_v52, 7  ;;  %v2616_v41 = vperm.slane %v2495_v46, 6 }
  0x56   :  { %v2619_v42 = vperm.slane %v2495_v46, 7  ;;  %v2063_v43 = vpop.eup %2062  ;;  %v1189_v44 = vmul.f32 %v2061_v37, %v2047_v23  ;;  %2070 = vpow2.f32 %v763_v16  ;;  %v889_v47 = vadd.f32 %v2603_v2, %v888_v32 }
  0x57   :  { %v898_v27 = vadd.f32 %v2605_v6, %v897_v34  ;;  %v1190_v50 = vmul.f32 %v2063_v43, %v2051_v40  ;;  %2072 = vpow2.f32 %v777_v18  ;;  %v169_v57 = vsub.f32 %v137_v35, %v2433_v24 }
  0x58   :  { %v170_v61 = vsub.f32 %v138_v38, %v2433_v24  ;;  %v1253_v62 = vmul.f32 %v2564_v15, %v1189_v44  ;;  %v1261_v0 = vmul.f32 %v2571_v31, %v1189_v44  ;;  %2074 = vpow2.f32 %v779_v22 }
  0x59   :  { %v890_v3 = vrot.slane %v889_v47, 4  ;;  %v2627_v5 = vpop.eup %2064  ;;  %v1254_v23 = vmul.f32 %v2568_v21, %v1190_v50  ;;  %v1262_v54 = vmul.f32 %v2574_v36, %v1190_v50  ;;  %2076 = vpow2.f32 %v793_v26 }
  0x5a   :  { %v899_v53 = vrot.slane %v898_v27, 4  ;;  %v2631_v40 = vpop.eup %2066  ;;  %2078 = vpow2.f32 %v795_v28  ;;  %v177_v59 = vsub.f32 %v137_v35, %v2437_v29  ;;  %v178_v15 = vsub.f32 %v138_v38, %v2437_v29 }
  0x5b   :  { %v891_v8 = vadd.f32 %v890_v3, %v889_v47  ;;  %v2635_v12 = vpop.eup %2068  ;;  %v1309_v31 = vpack.c.bf16 %v1254_v23, %v1253_v62  ;;  %v1313_v13 = vpack.c.bf16 %v1262_v54, %v1261_v0  ;;  %v185_v18 = vsub.f32 %v137_v35, %v2439_v30 }
  0x5c   :  { %v900_v16 = vadd.f32 %v899_v53, %v898_v27  ;;  %v2638_v21 = vpop.eup %2070  ;;  %v1031_v20 = vadd.f32 %v2635_v12, %v2627_v5  ;;  %v186_v22 = vsub.f32 %v138_v38, %v2439_v30  ;;  %v193_v26 = vsub.f32 %v137_v35, %v2452_v48 }
  0x5d   :  { %v892_v36 = vrot.slane %v891_v8, 2  ;;  %v2644_v28 = vpop.eup %2072  ;;  %v1445_v32 = vunpack.c.l.b16 %v1309_v31  ;;  %v1453_v34 = vunpack.c.l.b16 %v1313_v13  ;;  %v1446_v37 = vunpack.c.h.b16 %v1309_v31 }
  0x5e   :  { %v1454_v43 = vunpack.c.h.b16 %v1313_v13  ;;  %v2646_v47 = vpop.eup %2074  ;;  %v901_v62 = vrot.slane %v900_v16, 2  ;;  %v1032_v0 = vadd.f32 %v2644_v28, %v1031_v20  ;;  %v1040_v3 = vadd.f32 %v2638_v21, %v2631_v40 }
  0x5f   :  { %v893_v27 = vadd.f32 %v892_v36, %v891_v8  ;;  %v2651_v23 = vpop.eup %2076  ;;  %v1469_v54 = vpack.c.b16 %v1453_v34, %v1445_v32  ;;  %v194_v35 = vsub.f32 %v138_v38, %v2452_v48  ;;  %v233_v6 = vmul.f32 %v169_v57, %v169_v57 }
  0x60   :  { %v1470_v53 = vpack.c.b16 %v1454_v43, %v1446_v37  ;;  %v2654_v2 = vpop.eup %2078  ;;  %v902_v13 = vadd.f32 %v901_v62, %v900_v16  ;;  %v1033_v58 = vadd.f32 %v2651_v23, %v1032_v0  ;;  %v1041_v8 = vadd.f32 %v2646_v47, %v1040_v3 }
  0x61   :  { %v894_v31 = vrot.slane %v893_v27, 1  ;;  %1499 = vmatpush.bf16.xpose.msra.mxu0 %v1469_v54  ;;  %v1237_v36 = vmul.f32 %v2554_v56, %v1189_v44  ;;  %v1238_v20 = vmul.f32 %v2556_v1, %v1190_v50  ;;  %v1245_v32 = vmul.f32 %v2558_v49, %v1189_v44 }
  0x62   :  { %1518 = vmatpush.bf16.xpose.msra.mxu1 %v1470_v53  ;;  %v2661_v34 = vmul.f32 -480.5, %v233_v6  ;;  %v903_v57 = vrot.slane %v902_v13, 1  ;;  %v1034_v37 = vrot.slane %v1033_v58, 4  ;;  %v1042_v43 = vadd.f32 %v2654_v2, %v1041_v8 }
  0x63   :  { %v895_v38 = vadd.f32 %v894_v31, %v893_v27  ;;  %v1246_v16 = vmul.f32 %v2560_v10, %v1190_v50  ;;  %v1301_v62 = vpack.c.bf16 %v1238_v20, %v1237_v36  ;;  %v234_v0 = vmul.f32 %v170_v61, %v170_v61 }
  0x64   :  { %v241_v3 = vmul.f32 %v177_v59, %v177_v59  ;;  %v904_v54 = vadd.f32 %v903_v57, %v902_v13  ;;  %v1035_v53 = vadd.f32 %v1034_v37, %v1033_v58  ;;  %v1043_v45 = vrot.slane %v1042_v43, 4 }
  0x65   :  { %2080 = vrcp.f32 %v895_v38  ;;  %v1305_v56 = vpack.c.bf16 %v1246_v16, %v1245_v32  ;;  %v1429_v1 = vunpack.c.l.b16 %v1301_v62  ;;  %v1430_v25 = vunpack.c.h.b16 %v1301_v62 }
  0x66   :  { %v242_v49 = vmul.f32 %v178_v15, %v178_v15  ;;  %v1036_v6 = vrot.slane %v1035_v53, 2  ;;  %v1044_v44 = vadd.f32 %v1043_v45, %v1042_v43  ;;  %2082 = vrcp.f32 %v904_v54 }
  0x67   :  { %v249_v27 = vmul.f32 %v185_v18, %v185_v18  ;;  %v1437_v31 = vunpack.c.l.b16 %v1305_v56  ;;  %v1438_v19 = vunpack.c.h.b16 %v1305_v56  ;;  %v250_v8 = vmul.f32 %v186_v22, %v186_v22 }
  0x68   :  { %v257_v14 = vmul.f32 %v193_v26, %v193_v26  ;;  %v1037_v10 = vadd.f32 %v1036_v6, %v1035_v53  ;;  %v1045_v50 = vrot.slane %v1044_v44, 2  ;;  %v258_v61 = vmul.f32 %v194_v35, %v194_v35 }
  0x69   :  { %v298_v59 = vmul.f32 -480.5, %v234_v0  ;;  %v1461_v13 = vpack.c.b16 %v1437_v31, %v1429_v1  ;;  %v1462_v58 = vpack.c.b16 %v1438_v19, %v1430_v25  ;;  %v1205_v36 = vpack.c.bf16 %v2516_v60, %v2510_v55 }
  0x6a   :  { %v1209_v15 = vpack.c.bf16 %v2526_v4, %v2521_v63  ;;  %v1038_v45 = vrot.slane %v1037_v10, 1  ;;  %v1046_v32 = vadd.f32 %v1045_v50, %v1044_v44  ;;  %v1206_v18 = vpack.c.bf16 %v2587_v11, %v2583_v7 }
  0x6b   :  { %v2081_v20 = vpop.eup %2080  ;;  %v1210_v22 = vpack.c.bf16 %v2597_v33, %v2591_v17  ;;  %1500 = vmatpush.bf16.xpose.msra.mxu0 %v1461_v13  ;;  %1519 = vmatpush.bf16.xpose.msra.mxu1 %v1462_v58  ;;  %v1349_v26 = vunpack.c.l.b16 %v1205_v36  ;;  %v1350_v19 = vunpack.c.h.b16 %v1205_v36  ;;  %v305_v11 = vmul.f32 -480.5, %v241_v3 }
  0x6c   :  { %v1357_v35 = vunpack.c.l.b16 %v1209_v15  ;;  %v1358_v25 = vunpack.c.h.b16 %v1209_v15  ;;  %v2083_v38 = vpop.eup %2082  ;;  %v1039_v55 = vadd.f32 %v1038_v45, %v1037_v10  ;;  %v1047_v60 = vrot.slane %v1046_v32, 1 }
  0x6d   :  { %v1351_v57 = vunpack.c.l.b16 %v1206_v18  ;;  %v1359_v63 = vunpack.c.l.b16 %v1210_v22  ;;  %v1352_v43 = vunpack.c.h.b16 %v1206_v18  ;;  %v1360_v16 = vunpack.c.h.b16 %v1210_v22 }
  0x6e   :  { %v1381_v4 = vpack.c.b16 %v1357_v35, %v1349_v26  ;;  %v1382_v37 = vpack.c.b16 %v1358_v25, %v1350_v19  ;;  %v1048_v62 = vadd.f32 %v1047_v60, %v1046_v32  ;;  %2084 = vrcp.f32 %v1039_v55 }
  0x6f   :  { %v2673_v7 = vpack.c.b16 %v1359_v63, %v1351_v57  ;;  %v2675_v17 = vpack.c.b16 %v1360_v16, %v1352_v43  ;;  %v306_v33 = vmul.f32 -480.5, %v242_v49  ;;  %v313_v0 = vmul.f32 -480.5, %v249_v27 }
  0x70   :  { %v314_v54 = vmul.f32 -480.5, %v250_v8  ;;  %2086 = vrcp.f32 %v1048_v62  ;;  %v321_v53 = vmul.f32 -480.5, %v257_v14  ;;  %v322_v56 = vmul.f32 -480.5, %v258_v61 }
  0x71   :  { %v367_v1 = vmul.f32 1.442695, %v2661_v34  ;;  %v369_v6 = vmul.f32 1.442695, %v298_v59  ;;  %v383_v44 = vmul.f32 1.442695, %v305_v11  ;;  %v555_v10 = vsub.f32 %v2616_v41, %v2433_v24 }
  0x72   :  { %v385_v31 = vmul.f32 1.442695, %v306_v33  ;;  %1501 = vmatmul.bf16.vlgmr.msra.gmra.mxu0 %v1381_v4  ;;  %1520 = vmatmul.bf16.vlgmr.msra.gmra.mxu1 %v1382_v37  ;;  %v399_v3 = vmul.f32 1.442695, %v313_v0  ;;  %v401_v50 = vmul.f32 1.442695, %v314_v54  ;;  %v556_v14 = vsub.f32 %v2619_v42, %v2433_v24 }
  0x73   :  { %2088 = vpow2.f32 %v367_v1  ;;  %v415_v13 = vmul.f32 1.442695, %v321_v53  ;;  %v417_v49 = vmul.f32 1.442695, %v322_v56  ;;  %v563_v34 = vsub.f32 %v2616_v41, %v2437_v29 }
  0x74   :  { %2090 = vpow2.f32 %v369_v6  ;;  %v2085_v27 = vpop.eup %2084  ;;  %v564_v8 = vsub.f32 %v2619_v42, %v2437_v29  ;;  %v571_v61 = vsub.f32 %v2616_v41, %v2439_v30  ;;  %v572_v59 = vsub.f32 %v2619_v42, %v2439_v30 }
  0x75   :  { %2092 = vpow2.f32 %v383_v44  ;;  %v1191_v58 = vmul.f32 %v2085_v27, %v2081_v20  ;;  %v579_v36 = vsub.f32 %v2616_v41, %v2452_v48  ;;  %v580_v15 = vsub.f32 %v2619_v42, %v2452_v48 }
  0x76   :  { %2094 = vpow2.f32 %v385_v31  ;;  %v2087_v45 = vpop.eup %2086  ;;  %v619_v32 = vmul.f32 %v555_v10, %v555_v10  ;;  %v620_v18 = vmul.f32 %v556_v14, %v556_v14  ;;  %v627_v22 = vmul.f32 %v563_v34, %v563_v34 }
  0x77   :  { %2096 = vpow2.f32 %v399_v3  ;;  %v1192_v26 = vmul.f32 %v2087_v45, %v2083_v38  ;;  %v1255_v35 = vmul.f32 %v2644_v28, %v1191_v58  ;;  %v1263_v19 = vmul.f32 %v2651_v23, %v1191_v58 }
  0x78   :  { %v1239_v25 = vmul.f32 %v2627_v5, %v1191_v58  ;;  %v1247_v55 = vmul.f32 %v2635_v12, %v1191_v58  ;;  %2098 = vpow2.f32 %v401_v50  ;;  %v628_v41 = vmul.f32 %v564_v8, %v564_v8 }
  0x79   :  { %v2697_v20 = vpop.eup %2088  ;;  %v635_v60 = vmul.f32 %v571_v61, %v571_v61  ;;  %v1256_v57 = vmul.f32 %v2646_v47, %v1192_v26  ;;  %v1264_v63 = vmul.f32 %v2654_v2, %v1192_v26  ;;  %v1240_v38 = vmul.f32 %v2631_v40, %v1192_v26 }
  0x7a   :  { %v2700_v42 = vpop.eup %2090  ;;  %v1248_v28 = vmul.f32 %v2638_v21, %v1192_v26  ;;  %2100 = vpow2.f32 %v415_v13  ;;  %v636_v5 = vmul.f32 %v572_v59, %v572_v59  ;;  %v643_v4 = vmul.f32 %v579_v36, %v579_v36 }
  0x7b   :  { %v2706_v23 = vpop.eup %2092  ;;  %v644_v37 = vmul.f32 %v580_v15, %v580_v15  ;;  %v1310_v43 = vpack.c.bf16 %v1256_v57, %v1255_v35  ;;  %v1314_v16 = vpack.c.bf16 %v1264_v63, %v1263_v19  ;;  %v1302_v62 = vpack.c.bf16 %v1240_v38, %v1239_v25 }
  0x7c   :  { %v2708_v12 = vpop.eup %2094  ;;  %v1306_v11 = vpack.c.bf16 %v1248_v28, %v1247_v55  ;;  %2102 = vpow2.f32 %v417_v49  ;;  %v683_v2 = vmul.f32 -480.5, %v619_v32  ;;  %v684_v47 = vmul.f32 -480.5, %v620_v18 }
  0x7d   :  { %v2710_v33 = vpop.eup %2096  ;;  %v691_v40 = vmul.f32 -480.5, %v627_v22  ;;  %v1447_v0 = vunpack.c.l.b16 %v1310_v43  ;;  %v1455_v21 = vunpack.c.l.b16 %v1314_v16  ;;  %v1448_v54 = vunpack.c.h.b16 %v1310_v43 }
  0x7e   :  { %3399 = vst [vmem:[#allocation18_spill] sm:$0xff] %v2710_v33  ;;  %v1456_v53 = vunpack.c.h.b16 %v1314_v16  ;;  %v2712_v56 = vpop.eup %2098  ;;  %v1431_v1 = vunpack.c.l.b16 %v1302_v62  ;;  %v1439_v6 = vunpack.c.l.b16 %v1306_v11  ;;  %v1432_v44 = vunpack.c.h.b16 %v1302_v62 }
  0x7f   :  { %3400 = vst [vmem:[#allocation19_spill] sm:$0xff] %v2712_v56  ;;  %v1440_v31 = vunpack.c.h.b16 %v1306_v11  ;;  %v1471_v10 = vpack.c.b16 %v1455_v21, %v1447_v0  ;;  %v692_v50 = vmul.f32 -480.5, %v628_v41  ;;  %v699_v13 = vmul.f32 -480.5, %v635_v60 }
  0x80   :  { %v1472_v3 = vpack.c.b16 %v1456_v53, %v1448_v54  ;;  %v2714_v14 = vpop.eup %2100  ;;  %v1463_v49 = vpack.c.b16 %v1439_v6, %v1431_v1  ;;  %v700_v27 = vmul.f32 -480.5, %v636_v5  ;;  %v707_v8 = vmul.f32 -480.5, %v643_v4 }
  0x81   :  { %3401 = vst [vmem:[#allocation20_spill] sm:$0xff] %v2714_v14  ;;  %v1464_v34 = vpack.c.b16 %v1440_v31, %v1432_v44  ;;  %1537 = vmatpush.bf16.xpose.msra.mxu2 %v1471_v10  ;;  %v708_v61 = vmul.f32 -480.5, %v644_v37  ;;  %v753_v59 = vmul.f32 1.442695, %v683_v2  ;;  %v755_v58 = vmul.f32 1.442695, %v684_v47 }
  0x82   :  { %1556 = vmatpush.bf16.xpose.msra.mxu3 %v1472_v3  ;;  %v923_v36 = vadd.f32 %v2706_v23, %v2697_v20  ;;  %v2718_v15 = vpop.eup %2102  ;;  %v769_v45 = vmul.f32 1.442695, %v691_v40  ;;  %v771_v32 = vmul.f32 1.442695, %v692_v50  ;;  %v785_v18 = vmul.f32 1.442695, %v699_v13 }
  0x83   :  { %3402 = vst [vmem:[#allocation21_spill] sm:$0xff] %v2718_v15  ;;  %v932_v22 = vadd.f32 %v2708_v12, %v2700_v42  ;;  %2104 = vpow2.f32 %v753_v59  ;;  %v787_v26 = vmul.f32 1.442695, %v700_v27  ;;  %v801_v35 = vmul.f32 1.442695, %v707_v8 }
  0x84   :  { %v803_v19 = vmul.f32 1.442695, %v708_v61  ;;  %2106 = vpow2.f32 %v755_v58  ;;  %v924_v25 = vadd.f32 %v2710_v33, %v923_v36  ;;  %v135_v41 = vperm.slane %v2458_v52, 4 }
  0x85   :  { %v933_v55 = vadd.f32 %v2712_v56, %v932_v22  ;;  %2108 = vpow2.f32 %v769_v45  ;;  %v136_v60 = vperm.slane %v2458_v52, 5  ;;  %v2727_v57 = vperm.slane %v2495_v46, 4 }
  0x86   :  { %v2730_v63 = vperm.slane %v2495_v46, 5  ;;  %2110 = vpow2.f32 %v771_v32  ;;  %v925_v38 = vadd.f32 %v2714_v14, %v924_v25  ;;  %v167_v5 = vsub.f32 %v135_v41, %v2433_v24 }
  0x87   :  { %v934_v28 = vadd.f32 %v2718_v15, %v933_v55  ;;  %2112 = vpow2.f32 %v785_v18  ;;  %v168_v4 = vsub.f32 %v136_v60, %v2433_v24  ;;  %v175_v37 = vsub.f32 %v135_v41, %v2437_v29 }
  0x88   :  { %v176_v52 = vsub.f32 %v136_v60, %v2437_v29  ;;  %2114 = vpow2.f32 %v787_v26  ;;  %v926_v43 = vrot.slane %v925_v38, 4  ;;  %v183_v46 = vsub.f32 %v135_v41, %v2439_v30 }
  0x89   :  { %v935_v16 = vrot.slane %v934_v28, 4  ;;  %v2739_v62 = vpop.eup %2104  ;;  %1538 = vmatpush.bf16.xpose.msra.mxu2 %v1463_v49  ;;  %2116 = vpow2.f32 %v801_v35  ;;  %v184_v11 = vsub.f32 %v136_v60, %v2439_v30  ;;  %v191_v2 = vsub.f32 %v135_v41, %v2452_v48 }
  0x8a   :  { %1557 = vmatpush.bf16.xpose.msra.mxu3 %v1464_v34  ;;  %v192_v47 = vsub.f32 %v136_v60, %v2452_v48  ;;  %v2744_v40 = vpop.eup %2106  ;;  %2118 = vpow2.f32 %v803_v19  ;;  %v927_v0 = vadd.f32 %v926_v43, %v925_v38  ;;  %v231_v54 = vmul.f32 %v167_v5, %v167_v5 }
  0x8b   :  { %v936_v21 = vadd.f32 %v935_v16, %v934_v28  ;;  %v2746_v53 = vpop.eup %2108  ;;  %v232_v1 = vmul.f32 %v168_v4, %v168_v4  ;;  %v239_v6 = vmul.f32 %v175_v37, %v175_v37  ;;  %v240_v44 = vmul.f32 %v176_v52, %v176_v52 }
  0x8c   :  { %v247_v31 = vmul.f32 %v183_v46, %v183_v46  ;;  %v2748_v10 = vpop.eup %2110  ;;  %v928_v3 = vrot.slane %v927_v0, 2  ;;  %v1067_v13 = vadd.f32 %v2746_v53, %v2739_v62  ;;  %v248_v49 = vmul.f32 %v184_v11, %v184_v11 }
  0x8d   :  { %v937_v50 = vrot.slane %v936_v21, 2  ;;  %v2752_v34 = vpop.eup %2112  ;;  %v1076_v27 = vadd.f32 %v2748_v10, %v2744_v40  ;;  %v255_v8 = vmul.f32 %v191_v2, %v191_v2  ;;  %v256_v61 = vmul.f32 %v192_v47, %v192_v47 }
  0x8e   :  { %v295_v59 = vmul.f32 -480.5, %v231_v54  ;;  %v2756_v58 = vpop.eup %2114  ;;  %v929_v36 = vadd.f32 %v928_v3, %v927_v0  ;;  %v1068_v32 = vadd.f32 %v2752_v34, %v1067_v13  ;;  %v296_v18 = vmul.f32 -480.5, %v232_v1 }
  0x8f   :  { %v938_v45 = vadd.f32 %v937_v50, %v936_v21  ;;  %v2759_v22 = vpop.eup %2116  ;;  %v1077_v26 = vadd.f32 %v2756_v58, %v1076_v27  ;;  %v303_v35 = vmul.f32 -480.5, %v239_v6  ;;  %v304_v19 = vmul.f32 -480.5, %v240_v44 }
  0x90   :  { %v311_v25 = vmul.f32 -480.5, %v247_v31  ;;  %v2762_v55 = vpop.eup %2118  ;;  %1539 = vmatmul.bf16.vlgmr.msra.gmra.mxu2 %v2673_v7  ;;  %v930_v41 = vrot.slane %v929_v36, 1  ;;  %v1069_v38 = vadd.f32 %v2759_v22, %v1068_v32  ;;  %v312_v28 = vmul.f32 -480.5, %v248_v49 }
  0x91   :  { %1558 = vmatmul.bf16.vlgmr.msra.gmra.mxu3 %v2675_v17  ;;  %v939_v60 = vrot.slane %v938_v45, 1  ;;  %v1078_v5 = vadd.f32 %v2762_v55, %v1077_v26  ;;  %v319_v4 = vmul.f32 -480.5, %v255_v8  ;;  %v320_v37 = vmul.f32 -480.5, %v256_v61 }
  0x92   :  { %v363_v52 = vmul.f32 1.442695, %v295_v59  ;;  %v931_v43 = vadd.f32 %v930_v41, %v929_v36  ;;  %v1070_v46 = vrot.slane %v1069_v38, 4  ;;  %v365_v11 = vmul.f32 1.442695, %v296_v18 }
  0x93   :  { %v940_v16 = vadd.f32 %v939_v60, %v938_v45  ;;  %v1079_v2 = vrot.slane %v1078_v5, 4  ;;  %v379_v47 = vmul.f32 1.442695, %v303_v35  ;;  %v381_v7 = vmul.f32 1.442695, %v304_v19 }
  0x94   :  { %2120 = vpow2.f32 %v363_v52  ;;  %v1071_v0 = vadd.f32 %v1070_v46, %v1069_v38  ;;  %v395_v17 = vmul.f32 1.442695, %v311_v25  ;;  %v397_v21 = vmul.f32 1.442695, %v312_v28 }
  0x95   :  { %2122 = vrcp.f32 %v931_v43  ;;  %v1080_v54 = vadd.f32 %v1079_v2, %v1078_v5  ;;  %v411_v1 = vmul.f32 1.442695, %v319_v4  ;;  %v413_v6 = vmul.f32 1.442695, %v320_v37 }
  0x96   :  { %2124 = vrcp.f32 %v940_v16  ;;  %v1072_v44 = vrot.slane %v1071_v0, 2  ;;  %v553_v31 = vsub.f32 %v2727_v57, %v2433_v24  ;;  %v554_v3 = vsub.f32 %v2730_v63, %v2433_v24 }
  0x97   :  { %2126 = vpow2.f32 %v365_v11  ;;  %v1081_v50 = vrot.slane %v1080_v54, 2  ;;  %v561_v13 = vsub.f32 %v2727_v57, %v2437_v29  ;;  %v562_v49 = vsub.f32 %v2730_v63, %v2437_v29 }
  0x98   :  { %2128 = vpow2.f32 %v379_v47  ;;  %v1073_v27 = vadd.f32 %v1072_v44, %v1071_v0  ;;  %v569_v8 = vsub.f32 %v2727_v57, %v2439_v30  ;;  %v570_v61 = vsub.f32 %v2730_v63, %v2439_v30 }
  0x99   :  { %2130 = vpow2.f32 %v381_v7  ;;  %v1082_v36 = vadd.f32 %v1081_v50, %v1080_v54  ;;  %v577_v45 = vsub.f32 %v2727_v57, %v2452_v48  ;;  %v578_v32 = vsub.f32 %v2730_v63, %v2452_v48 }
  0x9a   :  { %v2780_v59 = vpop.eup %2120  ;;  %2132 = vpow2.f32 %v395_v17  ;;  %v1074_v26 = vrot.slane %v1073_v27, 1  ;;  %v617_v35 = vmul.f32 %v553_v31, %v553_v31  ;;  %v618_v19 = vmul.f32 %v554_v3, %v554_v3 }
  0x9b   :  { %v2123_v18 = vpop.eup %2122  ;;  %2134 = vpow2.f32 %v397_v21  ;;  %v1083_v41 = vrot.slane %v1082_v36, 1  ;;  %v625_v60 = vmul.f32 %v561_v13, %v561_v13  ;;  %v626_v38 = vmul.f32 %v562_v49, %v562_v49 }
  0x9c   :  { %v2125_v25 = vpop.eup %2124  ;;  %2136 = vpow2.f32 %v411_v1  ;;  %v1075_v5 = vadd.f32 %v1074_v26, %v1073_v27  ;;  %v633_v4 = vmul.f32 %v569_v8, %v569_v8  ;;  %v634_v37 = vmul.f32 %v570_v61, %v570_v61 }
  0x9d   :  { %v2786_v28 = vpop.eup %2126  ;;  %2138 = vpow2.f32 %v413_v6  ;;  %v1084_v52 = vadd.f32 %v1083_v41, %v1082_v36  ;;  %v641_v63 = vmul.f32 %v577_v45, %v577_v45  ;;  %v642_v43 = vmul.f32 %v578_v32, %v578_v32 }
  0x9e   :  { %v2788_v57 = vpop.eup %2128  ;;  %v681_v16 = vmul.f32 -480.5, %v617_v35  ;;  %2140 = vrcp.f32 %v1075_v5  ;;  %v682_v11 = vmul.f32 -480.5, %v618_v19  ;;  %v689_v2 = vmul.f32 -480.5, %v625_v60 }
  0x9f   :  { %v2790_v46 = vpop.eup %2130  ;;  %v690_v47 = vmul.f32 -480.5, %v626_v38  ;;  %2142 = vrcp.f32 %v1084_v52  ;;  %v697_v0 = vmul.f32 -480.5, %v633_v4  ;;  %v698_v17 = vmul.f32 -480.5, %v634_v37 }
  0xa0   :  { %v2792_v7 = vpop.eup %2132  ;;  %v705_v21 = vmul.f32 -480.5, %v641_v63  ;;  %v706_v1 = vmul.f32 -480.5, %v642_v43  ;;  %v749_v6 = vmul.f32 1.442695, %v681_v16  ;;  %v751_v44 = vmul.f32 1.442695, %v682_v11 }
  0xa1   :  { %v2794_v54 = vpop.eup %2134  ;;  %v905_v31 = vadd.f32 %v2788_v57, %v2780_v59  ;;  %v765_v50 = vmul.f32 1.442695, %v689_v2  ;;  %v767_v13 = vmul.f32 1.442695, %v690_v47  ;;  %v914_v49 = vadd.f32 %v2790_v46, %v2786_v28 }
  0xa2   :  { %v2798_v3 = vpop.eup %2136  ;;  %2144 = vpow2.f32 %v749_v6  ;;  %v781_v8 = vmul.f32 1.442695, %v697_v0  ;;  %v783_v61 = vmul.f32 1.442695, %v698_v17  ;;  %v797_v36 = vmul.f32 1.442695, %v705_v21 }
  0xa3   :  { %v2802_v27 = vpop.eup %2138  ;;  %2146 = vpow2.f32 %v751_v44  ;;  %v906_v45 = vadd.f32 %v2792_v7, %v905_v31  ;;  %v915_v32 = vadd.f32 %v2794_v54, %v914_v49  ;;  %v2807_v26 = vperm.slane %v2504_v51, 2  ;;  %v3406_v6 = vld [vmem:[#allocation13_spill] sm:$0xff]  ;;  %v3407_v49 = vld [vmem:[#allocation14_spill] sm:$0xff] }
  0xa4   :  { %3403 = vst [vmem:[#allocation22_spill] sm:$0xff] %v2802_v27  ;;  %v2141_v35 = vpop.eup %2140  ;;  %2148 = vpow2.f32 %v765_v50  ;;  %v799_v19 = vmul.f32 1.442695, %v706_v1  ;;  %v2810_v41 = vperm.slane %v2504_v51, 3  ;;  %v2813_v60 = vperm.slane %v2579_v39, 2 }
  0xa5   :  { %v2143_v38 = vpop.eup %2142  ;;  %v2815_v5 = vmul.f32 %v2141_v35, %v2123_v18  ;;  %2150 = vpow2.f32 %v767_v13  ;;  %v907_v4 = vadd.f32 %v2798_v3, %v906_v45  ;;  %v916_v37 = vadd.f32 %v2802_v27, %v915_v32 }
  0xa6   :  { %v2819_v52 = vmul.f32 %v2143_v38, %v2125_v25  ;;  %2152 = vpow2.f32 %v781_v8  ;;  %v2823_v63 = vsub.f32 %v2807_v26, %v2433_v24  ;;  %v2826_v43 = vperm.slane %v2579_v39, 3  ;;  %v3408_v8 = vld [vmem:[#allocation15_spill] sm:$0xff] }
  0xa7   :  { %v1259_v16 = vmul.f32 %v2752_v34, %v2815_v5  ;;  %v1267_v18 = vmul.f32 %v2759_v22, %v2815_v5  ;;  %2154 = vpow2.f32 %v783_v61  ;;  %v908_v11 = vrot.slane %v907_v4, 4  ;;  %v3404_v34 = vld [vmem:[#allocation11_spill] sm:$0xff]  ;;  %v3405_v22 = vld [vmem:[#allocation12_spill] sm:$0xff] }
  0xa8   :  { %v2832_v2 = vpop.eup %2144  ;;  %v1260_v25 = vmul.f32 %v2756_v58, %v2819_v52  ;;  %v1268_v47 = vmul.f32 %v2762_v55, %v2819_v52  ;;  %2156 = vpow2.f32 %v797_v36  ;;  %v917_v0 = vrot.slane %v916_v37, 4 }
  0xa9   :  { %v2838_v17 = vpop.eup %2146  ;;  %2158 = vpow2.f32 %v799_v19  ;;  %v909_v21 = vadd.f32 %v908_v11, %v907_v4  ;;  %v1213_v1 = vpack.c.bf16 %v3404_v34, %v2528_v9  ;;  %v1217_v44 = vpack.c.bf16 %v3406_v6, %v3405_v22 }
  0xaa   :  { %v2844_v31 = vpop.eup %2148  ;;  %v1312_v50 = vpack.c.bf16 %v1260_v25, %v1259_v16  ;;  %v1316_v13 = vpack.c.bf16 %v1268_v47, %v1267_v18  ;;  %v918_v58 = vadd.f32 %v917_v0, %v916_v37  ;;  %v1214_v55 = vpack.c.bf16 %v3408_v8, %v3407_v49 }
  0xab   :  { %v2848_v61 = vpop.eup %2150  ;;  %v910_v36 = vrot.slane %v909_v21, 2  ;;  %v1049_v45 = vadd.f32 %v2844_v31, %v2832_v2  ;;  %v1365_v32 = vunpack.c.l.b16 %v1213_v1  ;;  %v1373_v35 = vunpack.c.l.b16 %v1217_v44 }
  0xac   :  { %v2852_v9 = vpop.eup %2152  ;;  %v1451_v19 = vunpack.c.l.b16 %v1312_v50  ;;  %v1459_v38 = vunpack.c.l.b16 %v1316_v13  ;;  %v919_v4 = vrot.slane %v918_v58, 2  ;;  %v1058_v16 = vadd.f32 %v2848_v61, %v2838_v17 }
  0xad   :  { %v2856_v37 = vpop.eup %2154  ;;  %v911_v18 = vadd.f32 %v910_v36, %v909_v21  ;;  %v1050_v11 = vadd.f32 %v2852_v9, %v1049_v45  ;;  %v1452_v25 = vunpack.c.h.b16 %v1312_v50  ;;  %v1460_v47 = vunpack.c.h.b16 %v1316_v13  ;;  %v3409_v13 = vld [vmem:[#allocation16_spill] sm:$0xff]  ;;  %v3410_v45 = vld [vmem:[#allocation17_spill] sm:$0xff] }
  0xae   :  { %v2859_v0 = vpop.eup %2156  ;;  %v1475_v34 = vpack.c.b16 %v1459_v38, %v1451_v19  ;;  %v920_v22 = vadd.f32 %v919_v4, %v918_v58  ;;  %v1059_v6 = vadd.f32 %v2856_v37, %v1058_v16  ;;  %v1389_v49 = vpack.c.b16 %v1373_v35, %v1365_v32 }
  0xaf   :  { %v2862_v8 = vpop.eup %2158  ;;  %v912_v15 = vrot.slane %v911_v18, 1  ;;  %v1051_v14 = vadd.f32 %v2859_v0, %v1050_v11  ;;  %v1476_v56 = vpack.c.b16 %v1460_v47, %v1452_v25  ;;  %v1366_v33 = vunpack.c.h.b16 %v1213_v1 }
  0xb0   :  { %1613 = vmatpush.bf16.xpose.msrb.mxu2 %v1475_v34  ;;  %v921_v21 = vrot.slane %v920_v22, 1  ;;  %v1060_v36 = vadd.f32 %v2862_v8, %v1059_v6  ;;  %1506 = vmatmul.bf16.gmra.mxu0 %v1389_v49  ;;  %v1374_v50 = vunpack.c.h.b16 %v1217_v44  ;;  %v1218_v19 = vpack.c.bf16 %v3410_v45, %v3409_v13 }
  0xb1   :  { %v913_v58 = vadd.f32 %v912_v15, %v911_v18  ;;  %v1052_v38 = vrot.slane %v1051_v14, 4  ;;  %1632 = vmatpush.bf16.xpose.msrb.mxu3 %v1476_v56  ;;  %v1367_v32 = vunpack.c.l.b16 %v1214_v55  ;;  %v1368_v35 = vunpack.c.h.b16 %v1214_v55 }
  0xb2   :  { %v922_v4 = vadd.f32 %v921_v21, %v920_v22  ;;  %v1061_v16 = vrot.slane %v1060_v36, 4  ;;  %v1390_v27 = vpack.c.b16 %v1374_v50, %v1366_v33  ;;  %v1375_v11 = vunpack.c.l.b16 %v1218_v19 }
  0xb3   :  { %v1053_v25 = vadd.f32 %v1052_v38, %v1051_v14  ;;  %v1376_v1 = vunpack.c.h.b16 %v1218_v19  ;;  %v1243_v47 = vmul.f32 %v2739_v62, %v2815_v5  ;;  %v198_v44 = vsub.f32 %v2810_v41, %v2433_v24 }
  0xb4   :  { %v1062_v34 = vadd.f32 %v1061_v16, %v1060_v36  ;;  %2160 = vrcp.f32 %v913_v58  ;;  %1525 = vmatmul.bf16.gmra.mxu1 %v1390_v27  ;;  %v1391_v15 = vpack.c.b16 %v1375_v11, %v1367_v32  ;;  %v1244_v56 = vmul.f32 %v2744_v40, %v2819_v52 }
  0xb5   :  { %v1054_v55 = vrot.slane %v1053_v25, 2  ;;  %v1392_v18 = vpack.c.b16 %v1376_v1, %v1368_v35  ;;  %v1251_v33 = vmul.f32 %v2746_v53, %v2815_v5  ;;  %v1252_v14 = vmul.f32 %v2748_v10, %v2819_v52 }
  0xb6   :  { %v1063_v22 = vrot.slane %v1062_v34, 2  ;;  %2162 = vrcp.f32 %v922_v4  ;;  %1544 = vmatmul.bf16.gmra.mxu2 %v1391_v15  ;;  %v1304_v62 = vpack.c.bf16 %v1244_v56, %v1243_v47  ;;  %v205_v6 = vsub.f32 %v2807_v26, %v2437_v29 }
  0xb7   :  { %v1055_v27 = vadd.f32 %v1054_v55, %v1053_v25  ;;  %1563 = vmatmul.bf16.gmra.mxu3 %v1392_v18  ;;  %v1308_v49 = vpack.c.bf16 %v1252_v14, %v1251_v33  ;;  %v2882_v40 = vpack.c.bf16 %v2786_v28, %v2780_v59  ;;  %v2886_v53 = vpack.c.bf16 %v2790_v46, %v2788_v57 }
  0xb8   :  { %v1064_v5 = vadd.f32 %v1063_v22, %v1062_v34  ;;  %v1435_v10 = vunpack.c.l.b16 %v1304_v62  ;;  %v1436_v52 = vunpack.c.h.b16 %v1304_v62  ;;  %v1208_v21 = vpack.c.bf16 %v2700_v42, %v2697_v20 }
  0xb9   :  { %v1056_v36 = vrot.slane %v1055_v27, 1  ;;  %v1443_v50 = vunpack.c.l.b16 %v1308_v49  ;;  %v1444_v13 = vunpack.c.h.b16 %v1308_v49  ;;  %v1353_v45 = vunpack.c.l.b16 %v2882_v40 }
  0xba   :  { %v2161_v19 = vpop.eup %2160  ;;  %v1065_v58 = vrot.slane %v1064_v5, 1  ;;  %v1361_v59 = vunpack.c.l.b16 %v2886_v53  ;;  %v1354_v28 = vunpack.c.h.b16 %v2882_v40  ;;  %v206_v57 = vsub.f32 %v2810_v41, %v2437_v29 }
  0xbb   :  { %v1057_v46 = vadd.f32 %v1056_v36, %v1055_v27  ;;  %v1467_v38 = vpack.c.b16 %v1443_v50, %v1435_v10  ;;  %v1468_v32 = vpack.c.b16 %v1444_v13, %v1436_v52  ;;  %v1212_v20 = vpack.c.bf16 %v2708_v12, %v2706_v23 }
  0xbc   :  { %v2163_v42 = vpop.eup %2162  ;;  %v1066_v35 = vadd.f32 %v1065_v58, %v1064_v5  ;;  %v2897_v4 = vpack.c.b16 %v1361_v59, %v1353_v45  ;;  %v1362_v16 = vunpack.c.h.b16 %v2886_v53  ;;  %v1355_v11 = vunpack.c.l.b16 %v1208_v21 }
  0xbd   :  { %2164 = vrcp.f32 %v1057_v46  ;;  %1614 = vmatpush.bf16.xpose.msrb.mxu2 %v1467_v38  ;;  %1633 = vmatpush.bf16.xpose.msrb.mxu3 %v1468_v32  ;;  %v1363_v25 = vunpack.c.l.b16 %v1212_v20  ;;  %v1356_v1 = vunpack.c.h.b16 %v1208_v21  ;;  %v1364_v47 = vunpack.c.h.b16 %v1212_v20 }
  0xbe   :  { %2166 = vrcp.f32 %v1066_v35  ;;  %v213_v34 = vsub.f32 %v2807_v26, %v2439_v30  ;;  %v214_v23 = vsub.f32 %v2810_v41, %v2439_v30  ;;  %v221_v12 = vsub.f32 %v2807_v26, %v2452_v48 }
  0xbf   :  { %v1387_v15 = vpack.c.b16 %v1363_v25, %v1355_v11  ;;  %v1388_v56 = vpack.c.b16 %v1364_v47, %v1356_v1  ;;  %v222_v55 = vsub.f32 %v2810_v41, %v2452_v48  ;;  %v261_v18 = vmul.f32 %v2823_v63, %v2823_v63 }
  0xc0   :  { %v262_v33 = vmul.f32 %v198_v44, %v198_v44  ;;  %v269_v14 = vmul.f32 %v205_v6, %v205_v6  ;;  %v270_v22 = vmul.f32 %v206_v57, %v206_v57  ;;  %v277_v62 = vmul.f32 %v213_v34, %v213_v34 }
  0xc1   :  { %v278_v27 = vmul.f32 %v214_v23, %v214_v23  ;;  %v285_v49 = vmul.f32 %v221_v12, %v221_v12  ;;  %v286_v5 = vmul.f32 %v222_v55, %v222_v55  ;;  %v325_v10 = vmul.f32 -480.5, %v261_v18 }
  0xc2   :  { %v326_v52 = vmul.f32 -480.5, %v262_v33  ;;  %v333_v21 = vmul.f32 -480.5, %v269_v14  ;;  %v334_v36 = vmul.f32 -480.5, %v270_v22  ;;  %v341_v26 = vmul.f32 -480.5, %v277_v62 }
  0xc3   :  { %v2165_v50 = vpop.eup %2164  ;;  %v342_v13 = vmul.f32 -480.5, %v278_v27  ;;  %v349_v45 = vmul.f32 -480.5, %v285_v49  ;;  %v350_v58 = vmul.f32 -480.5, %v286_v5  ;;  %v423_v41 = vmul.f32 1.442695, %v325_v10 }
  0xc4   :  { %v2167_v59 = vpop.eup %2166  ;;  %v1193_v46 = vmul.f32 %v2165_v50, %v2161_v19  ;;  %v425_v63 = vmul.f32 1.442695, %v326_v52  ;;  %v439_v44 = vmul.f32 1.442695, %v333_v21  ;;  %v441_v6 = vmul.f32 1.442695, %v334_v36 }
  0xc5   :  { %v1194_v57 = vmul.f32 %v2167_v59, %v2163_v42  ;;  %2168 = vpow2.f32 %v423_v41  ;;  %v455_v38 = vmul.f32 1.442695, %v341_v26  ;;  %v457_v32 = vmul.f32 1.442695, %v342_v13 }
  0xc6   :  { %v1257_v20 = vmul.f32 %v2852_v9, %v1193_v46  ;;  %v1265_v35 = vmul.f32 %v2859_v0, %v1193_v46  ;;  %v1241_v11 = vmul.f32 %v2832_v2, %v1193_v46  ;;  %v1249_v25 = vmul.f32 %v2844_v31, %v1193_v46  ;;  %1615 = vmatmul.bf16.vlgmr.msrb.gmra.mxu2 %v1387_v15 }
  0xc7   :  { %v1258_v1 = vmul.f32 %v2856_v37, %v1194_v57  ;;  %v1266_v19 = vmul.f32 %v2862_v8, %v1194_v57  ;;  %v1242_v47 = vmul.f32 %v2838_v17, %v1194_v57  ;;  %v1250_v42 = vmul.f32 %v2848_v61, %v1194_v57  ;;  %1634 = vmatmul.bf16.vlgmr.msrb.gmra.mxu3 %v1388_v56 }
  0xc8   :  { %2170 = vpow2.f32 %v425_v63  ;;  %v471_v34 = vmul.f32 1.442695, %v349_v45  ;;  %v473_v23 = vmul.f32 1.442695, %v350_v58  ;;  %v583_v9 = vsub.f32 %v2813_v60, %v2433_v24 }
  0xc9   :  { %v1311_v0 = vpack.c.bf16 %v1258_v1, %v1257_v20  ;;  %v1315_v2 = vpack.c.bf16 %v1266_v19, %v1265_v35  ;;  %v1303_v12 = vpack.c.bf16 %v1242_v47, %v1241_v11  ;;  %v1307_v31 = vpack.c.bf16 %v1250_v42, %v1249_v25 }
  0xca   :  { %2172 = vpow2.f32 %v439_v44  ;;  %v584_v37 = vsub.f32 %v2826_v43, %v2433_v24  ;;  %v591_v17 = vsub.f32 %v2813_v60, %v2437_v29  ;;  %v592_v61 = vsub.f32 %v2826_v43, %v2437_v29 }
  0xcb   :  { %v2926_v8 = vpop.eup %2168  ;;  %v1449_v15 = vunpack.c.l.b16 %v1311_v0  ;;  %v1457_v56 = vunpack.c.l.b16 %v1315_v2  ;;  %v1450_v55 = vunpack.c.h.b16 %v1311_v0  ;;  %v1458_v18 = vunpack.c.h.b16 %v1315_v2 }
  0xcc   :  { %v1433_v33 = vunpack.c.l.b16 %v1303_v12  ;;  %v1441_v14 = vunpack.c.l.b16 %v1307_v31  ;;  %v1434_v22 = vunpack.c.h.b16 %v1303_v12  ;;  %v1442_v62 = vunpack.c.h.b16 %v1307_v31 }
  0xcd   :  { %v1473_v27 = vpack.c.b16 %v1457_v56, %v1449_v15  ;;  %v1474_v49 = vpack.c.b16 %v1458_v18, %v1450_v55  ;;  %2174 = vpow2.f32 %v441_v6  ;;  %v599_v5 = vsub.f32 %v2813_v60, %v2439_v30 }
  0xce   :  { %v2930_v10 = vpop.eup %2170  ;;  %v1465_v52 = vpack.c.b16 %v1441_v14, %v1433_v33  ;;  %v1466_v21 = vpack.c.b16 %v1442_v62, %v1434_v22  ;;  %2176 = vpow2.f32 %v455_v38  ;;  %v600_v36 = vsub.f32 %v2826_v43, %v2439_v30 }
  0xcf   :  { %1575 = vmatpush.bf16.xpose.msrb.mxu0 %v1473_v27  ;;  %1594 = vmatpush.bf16.xpose.msrb.mxu1 %v1474_v49  ;;  %2178 = vpow2.f32 %v457_v32  ;;  %v607_v26 = vsub.f32 %v2813_v60, %v2452_v48  ;;  %v608_v50 = vsub.f32 %v2826_v43, %v2452_v48  ;;  %v647_v13 = vmul.f32 %v583_v9, %v583_v9 }
  0xd0   :  { %v2938_v45 = vpop.eup %2172  ;;  %2180 = vpow2.f32 %v471_v34  ;;  %v648_v58 = vmul.f32 %v584_v37, %v584_v37  ;;  %v655_v41 = vmul.f32 %v591_v17, %v591_v17  ;;  %v656_v59 = vmul.f32 %v592_v61, %v592_v61 }
  0xd1   :  { %2182 = vpow2.f32 %v473_v23  ;;  %v663_v46 = vmul.f32 %v599_v5, %v599_v5  ;;  %v664_v63 = vmul.f32 %v600_v36, %v600_v36  ;;  %v671_v44 = vmul.f32 %v607_v26, %v607_v26 }
  0xd2   :  { %v672_v6 = vmul.f32 %v608_v50, %v608_v50  ;;  %v711_v57 = vmul.f32 -480.5, %v647_v13  ;;  %v712_v38 = vmul.f32 -480.5, %v648_v58  ;;  %v719_v32 = vmul.f32 -480.5, %v655_v41 }
  0xd3   :  { %v2940_v20 = vpop.eup %2174  ;;  %v720_v60 = vmul.f32 -480.5, %v656_v59  ;;  %v727_v35 = vmul.f32 -480.5, %v663_v46  ;;  %v728_v43 = vmul.f32 -480.5, %v664_v63  ;;  %v735_v11 = vmul.f32 -480.5, %v671_v44 }
  0xd4   :  { %v2942_v25 = vpop.eup %2176  ;;  %v736_v1 = vmul.f32 -480.5, %v672_v6  ;;  %v809_v19 = vmul.f32 1.442695, %v711_v57  ;;  %v811_v47 = vmul.f32 1.442695, %v712_v38  ;;  %v959_v42 = vadd.f32 %v2938_v45, %v2926_v8 }
  0xd5   :  { %3411 = vst [vmem:[#allocation11_spill] sm:$0xff] %v2942_v25  ;;  %v2946_v34 = vpop.eup %2178  ;;  %v1386_v23 = vpack.c.b16 %v1362_v16, %v1354_v28  ;;  %v825_v9 = vmul.f32 1.442695, %v719_v32  ;;  %v827_v0 = vmul.f32 1.442695, %v720_v60  ;;  %v968_v2 = vadd.f32 %v2940_v20, %v2930_v10 }
  0xd6   :  { %3412 = vst [vmem:[#allocation12_spill] sm:$0xff] %v2946_v34  ;;  %v2954_v12 = vpop.eup %2180  ;;  %2184 = vpow2.f32 %v809_v19  ;;  %v841_v31 = vmul.f32 1.442695, %v727_v35  ;;  %v843_v37 = vmul.f32 1.442695, %v728_v43  ;;  %v960_v40 = vadd.f32 %v2942_v25, %v959_v42 }
  0xd7   :  { %3413 = vst [vmem:[#allocation13_spill] sm:$0xff] %v2954_v12  ;;  %v857_v17 = vmul.f32 1.442695, %v735_v11  ;;  %v2956_v61 = vpop.eup %2182  ;;  %1576 = vmatpush.bf16.xpose.msrb.mxu0 %v1465_v52  ;;  %1595 = vmatpush.bf16.xpose.msrb.mxu1 %v1466_v21  ;;  %2186 = vpow2.f32 %v811_v47  ;;  %v969_v53 = vadd.f32 %v2946_v34, %v968_v2  ;;  %v139_v28 = vperm.slane %v2504_v51, 0 }
  0xd8   :  { %3414 = vst [vmem:[#allocation14_spill] sm:$0xff] %v2956_v61  ;;  %2188 = vpow2.f32 %v825_v9  ;;  %v859_v16 = vmul.f32 1.442695, %v736_v1  ;;  %v140_v15 = vperm.slane %v2504_v51, 1  ;;  %v2963_v56 = vperm.slane %v2579_v39, 0 }
  0xd9   :  { %2190 = vpow2.f32 %v827_v0  ;;  %v961_v55 = vadd.f32 %v2954_v12, %v960_v40  ;;  %v970_v18 = vadd.f32 %v2956_v61, %v969_v53  ;;  %v195_v33 = vsub.f32 %v139_v28, %v2433_v24 }
  0xda   :  { %2192 = vpow2.f32 %v841_v31  ;;  %v196_v14 = vsub.f32 %v140_v15, %v2433_v24  ;;  %v203_v22 = vsub.f32 %v139_v28, %v2437_v29  ;;  %v204_v62 = vsub.f32 %v140_v15, %v2437_v29 }
  0xdb   :  { %2194 = vpow2.f32 %v843_v37  ;;  %v962_v27 = vrot.slane %v961_v55, 4  ;;  %v971_v49 = vrot.slane %v970_v18, 4  ;;  %v211_v5 = vsub.f32 %v139_v28, %v2439_v30 }
  0xdc   :  { %v2972_v52 = vpop.eup %2184  ;;  %2196 = vpow2.f32 %v857_v17  ;;  %v212_v21 = vsub.f32 %v140_v15, %v2439_v30  ;;  %v219_v36 = vsub.f32 %v139_v28, %v2452_v48  ;;  %v220_v26 = vsub.f32 %v140_v15, %v2452_v48 }
  0xdd   :  { %v2977_v50 = vpop.eup %2186  ;;  %2198 = vpow2.f32 %v859_v16  ;;  %v963_v13 = vadd.f32 %v962_v27, %v961_v55  ;;  %v972_v58 = vadd.f32 %v971_v49, %v970_v18  ;;  %v259_v41 = vmul.f32 %v195_v33, %v195_v33 }
  0xde   :  { %v2979_v59 = vpop.eup %2188  ;;  %1577 = vmatmul.bf16.vlgmr.msrb.gmra.mxu0 %v2897_v4  ;;  %1596 = vmatmul.bf16.vlgmr.msrb.gmra.mxu1 %v1386_v23  ;;  %v260_v46 = vmul.f32 %v196_v14, %v196_v14  ;;  %v267_v63 = vmul.f32 %v203_v22, %v203_v22  ;;  %v268_v44 = vmul.f32 %v204_v62, %v204_v62  ;;  %v526_v6 = vperm.slane %v2579_v39, 1 }
  0xdf   :  { %v2983_v57 = vpop.eup %2190  ;;  %v964_v38 = vrot.slane %v963_v13, 2  ;;  %v973_v32 = vrot.slane %v972_v58, 2  ;;  %v1103_v60 = vadd.f32 %v2979_v59, %v2972_v52  ;;  %v275_v35 = vmul.f32 %v211_v5, %v211_v5 }
  0xe0   :  { %v2987_v43 = vpop.eup %2192  ;;  %v1112_v11 = vadd.f32 %v2983_v57, %v2977_v50  ;;  %v276_v4 = vmul.f32 %v212_v21, %v212_v21  ;;  %v283_v1 = vmul.f32 %v219_v36, %v219_v36  ;;  %v284_v19 = vmul.f32 %v220_v26, %v220_v26 }
  0xe1   :  { %v2991_v47 = vpop.eup %2194  ;;  %v965_v42 = vadd.f32 %v964_v38, %v963_v13  ;;  %v974_v23 = vadd.f32 %v973_v32, %v972_v58  ;;  %v1104_v9 = vadd.f32 %v2987_v43, %v1103_v60  ;;  %v323_v0 = vmul.f32 -480.5, %v259_v41 }
  0xe2   :  { %v2994_v2 = vpop.eup %2196  ;;  %v1113_v31 = vadd.f32 %v2991_v47, %v1112_v11  ;;  %v324_v37 = vmul.f32 -480.5, %v260_v46  ;;  %v331_v17 = vmul.f32 -480.5, %v267_v63  ;;  %v332_v40 = vmul.f32 -480.5, %v268_v44 }
  0xe3   :  { %v2997_v53 = vpop.eup %2198  ;;  %v966_v28 = vrot.slane %v965_v42, 1  ;;  %v975_v16 = vrot.slane %v974_v23, 1  ;;  %v1105_v15 = vadd.f32 %v2994_v2, %v1104_v9  ;;  %v339_v55 = vmul.f32 -480.5, %v275_v35 }
  0xe4   :  { %v1114_v18 = vadd.f32 %v2997_v53, %v1113_v31  ;;  %v340_v33 = vmul.f32 -480.5, %v276_v4  ;;  %v347_v14 = vmul.f32 -480.5, %v283_v1  ;;  %v348_v22 = vmul.f32 -480.5, %v284_v19 }
  0xe5   :  { %v967_v62 = vadd.f32 %v966_v28, %v965_v42  ;;  %v976_v27 = vadd.f32 %v975_v16, %v974_v23  ;;  %v1106_v49 = vrot.slane %v1105_v15, 4  ;;  %v419_v5 = vmul.f32 1.442695, %v323_v0 }
  0xe6   :  { %v1115_v21 = vrot.slane %v1114_v18, 4  ;;  %v421_v36 = vmul.f32 1.442695, %v324_v37  ;;  %v435_v26 = vmul.f32 1.442695, %v331_v17  ;;  %v581_v13 = vsub.f32 %v2963_v56, %v2433_v24 }
  0xe7   :  { %v1107_v58 = vadd.f32 %v1106_v49, %v1105_v15  ;;  %2200 = vrcp.f32 %v967_v62  ;;  %v437_v41 = vmul.f32 1.442695, %v332_v40  ;;  %v451_v46 = vmul.f32 1.442695, %v339_v55 }
  0xe8   :  { %v1116_v63 = vadd.f32 %v1115_v21, %v1114_v18  ;;  %2202 = vrcp.f32 %v976_v27  ;;  %v453_v44 = vmul.f32 1.442695, %v340_v33  ;;  %v467_v38 = vmul.f32 1.442695, %v347_v14 }
  0xe9   :  { %v1108_v32 = vrot.slane %v1107_v58, 2  ;;  %2204 = vpow2.f32 %v419_v5  ;;  %v469_v60 = vmul.f32 1.442695, %v348_v22  ;;  %v582_v35 = vsub.f32 %v526_v6, %v2433_v24 }
  0xea   :  { %v1117_v11 = vrot.slane %v1116_v63, 2  ;;  %2206 = vpow2.f32 %v421_v36  ;;  %v589_v4 = vsub.f32 %v2963_v56, %v2437_v29  ;;  %v590_v1 = vsub.f32 %v526_v6, %v2437_v29 }
  0xeb   :  { %v1109_v19 = vadd.f32 %v1108_v32, %v1107_v58  ;;  %2208 = vpow2.f32 %v435_v26  ;;  %v597_v42 = vsub.f32 %v2963_v56, %v2439_v30  ;;  %v598_v23 = vsub.f32 %v526_v6, %v2439_v30 }
  0xec   :  { %v1118_v9 = vadd.f32 %v1117_v11, %v1116_v63  ;;  %2210 = vpow2.f32 %v437_v41  ;;  %v605_v0 = vsub.f32 %v2963_v56, %v2452_v48  ;;  %v606_v31 = vsub.f32 %v526_v6, %v2452_v48 }
  0xed   :  { %v2201_v37 = vpop.eup %2200  ;;  %v1110_v17 = vrot.slane %v1109_v19, 1  ;;  %2212 = vpow2.f32 %v451_v46  ;;  %v645_v40 = vmul.f32 %v581_v13, %v581_v13  ;;  %v646_v28 = vmul.f32 %v582_v35, %v582_v35 }
  0xee   :  { %v2203_v16 = vpop.eup %2202  ;;  %v1119_v15 = vrot.slane %v1118_v9, 1  ;;  %2214 = vpow2.f32 %v453_v44  ;;  %v653_v55 = vmul.f32 %v589_v4, %v589_v4  ;;  %v654_v18 = vmul.f32 %v590_v1, %v590_v1 }
  0xef   :  { %v3013_v33 = vpop.eup %2204  ;;  %v1111_v14 = vadd.f32 %v1110_v17, %v1109_v19  ;;  %2216 = vpow2.f32 %v467_v38  ;;  %v661_v22 = vmul.f32 %v597_v42, %v597_v42  ;;  %v662_v62 = vmul.f32 %v598_v23, %v598_v23 }
  0xf0   :  { %v3015_v27 = vpop.eup %2206  ;;  %v1120_v56 = vadd.f32 %v1119_v15, %v1118_v9  ;;  %2218 = vpow2.f32 %v469_v60  ;;  %v669_v6 = vmul.f32 %v605_v0, %v605_v0  ;;  %v670_v49 = vmul.f32 %v606_v31, %v606_v31 }
  0xf1   :  { %v3017_v5 = vpop.eup %2208  ;;  %2220 = vrcp.f32 %v1111_v14  ;;  %v709_v21 = vmul.f32 -480.5, %v645_v40  ;;  %v710_v36 = vmul.f32 -480.5, %v646_v28  ;;  %v717_v26 = vmul.f32 -480.5, %v653_v55 }
  0xf2   :  { %v3019_v13 = vpop.eup %2210  ;;  %2222 = vrcp.f32 %v1120_v56  ;;  %v718_v58 = vmul.f32 -480.5, %v654_v18  ;;  %v725_v41 = vmul.f32 -480.5, %v661_v22  ;;  %v726_v46 = vmul.f32 -480.5, %v662_v62 }
  0xf3   :  { %v3021_v63 = vpop.eup %2212  ;;  %v733_v44 = vmul.f32 -480.5, %v669_v6  ;;  %v734_v38 = vmul.f32 -480.5, %v670_v49  ;;  %v805_v32 = vmul.f32 1.442695, %v709_v21  ;;  %v807_v60 = vmul.f32 1.442695, %v710_v36 }
  0xf4   :  { %v3023_v35 = vpop.eup %2214  ;;  %v821_v11 = vmul.f32 1.442695, %v717_v26  ;;  %v823_v4 = vmul.f32 1.442695, %v718_v58  ;;  %v941_v1 = vadd.f32 %v3017_v5, %v3013_v33  ;;  %v837_v42 = vmul.f32 1.442695, %v725_v41 }
  0xf5   :  { %v3027_v19 = vpop.eup %2216  ;;  %2224 = vpow2.f32 %v805_v32  ;;  %v839_v23 = vmul.f32 1.442695, %v726_v46  ;;  %v853_v9 = vmul.f32 1.442695, %v733_v44  ;;  %v950_v17 = vadd.f32 %v3019_v13, %v3015_v27 }
  0xf6   :  { %3415 = vst [vmem:[#allocation15_spill] sm:$0xff] %v3027_v19  ;;  %v3029_v0 = vpop.eup %2218  ;;  %2226 = vpow2.f32 %v807_v60  ;;  %v942_v31 = vadd.f32 %v3021_v63, %v941_v1  ;;  %v3035_v40 = vperm.slane %v2504_v51, 6  ;;  %v855_v15 = vmul.f32 1.442695, %v734_v38  ;;  %v3417_v38 = vld [vmem:[#allocation22_spill] sm:$0xff] }
  0xf7   :  { %3416 = vst [vmem:[#allocation16_spill] sm:$0xff] %v3029_v0  ;;  %v2221_v28 = vpop.eup %2220  ;;  %2228 = vpow2.f32 %v821_v11  ;;  %v3038_v55 = vperm.slane %v2504_v51, 7  ;;  %v3041_v18 = vperm.slane %v2579_v39, 6  ;;  %v951_v56 = vadd.f32 %v3023_v35, %v950_v17  ;;  %v3418_v1 = vld [vmem:[#allocation18_spill] sm:$0xff] }
  0xf8   :  { %v2223_v14 = vpop.eup %2222  ;;  %v3043_v22 = vmul.f32 %v2221_v28, %v2201_v37  ;;  %2230 = vpow2.f32 %v823_v4  ;;  %v943_v62 = vadd.f32 %v3027_v19, %v942_v31  ;;  %v3051_v49 = vsub.f32 %v3035_v40, %v2433_v24 }
  0xf9   :  { %v3047_v6 = vmul.f32 %v2223_v14, %v2203_v16  ;;  %2232 = vpow2.f32 %v837_v42  ;;  %v3054_v21 = vperm.slane %v2579_v39, 7  ;;  %v952_v46 = vadd.f32 %v3029_v0, %v951_v56 }
  0xfa   :  { %v1287_v36 = vmul.f32 %v2987_v43, %v3043_v22  ;;  %v1295_v37 = vmul.f32 %v2994_v2, %v3043_v22  ;;  %2234 = vpow2.f32 %v839_v23  ;;  %v944_v26 = vrot.slane %v943_v62, 4 }
  0xfb   :  { %v3060_v58 = vpop.eup %2224  ;;  %v1288_v16 = vmul.f32 %v2991_v47, %v3047_v6  ;;  %v1296_v41 = vmul.f32 %v2997_v53, %v3047_v6  ;;  %2236 = vpow2.f32 %v853_v9  ;;  %v1215_v2 = vpack.c.bf16 %v2794_v54, %v2792_v7  ;;  %v3419_v53 = vld [vmem:[#allocation19_spill] sm:$0xff] }
  0xfc   :  { %v3067_v44 = vpop.eup %2226  ;;  %2238 = vpow2.f32 %v855_v15  ;;  %v945_v43 = vadd.f32 %v944_v26, %v943_v62  ;;  %v1219_v32 = vpack.c.bf16 %v3417_v38, %v2798_v3  ;;  %v953_v4 = vrot.slane %v952_v46, 4 }
  0xfd   :  { %v3073_v60 = vpop.eup %2228  ;;  %v1326_v11 = vpack.c.bf16 %v1288_v16, %v1287_v36  ;;  %v1330_v47 = vpack.c.bf16 %v1296_v41, %v1295_v37  ;;  %v1216_v42 = vpack.c.bf16 %v3419_v53, %v3418_v1  ;;  %v1369_v17 = vunpack.c.l.b16 %v1215_v2 }
  0xfe   :  { %v3077_v23 = vpop.eup %2230  ;;  %v946_v9 = vrot.slane %v945_v43, 2  ;;  %v1085_v31 = vadd.f32 %v3073_v60, %v3060_v58  ;;  %v1377_v28 = vunpack.c.l.b16 %v1219_v32  ;;  %v954_v15 = vadd.f32 %v953_v4, %v952_v46 }
  0xff   :  { %v3081_v7 = vpop.eup %2232  ;;  %v1759_v54 = vunpack.c.l.b16 %v1326_v11  ;;  %v1767_v3 = vunpack.c.l.b16 %v1330_v47  ;;  %v1094_v14 = vadd.f32 %v3077_v23, %v3067_v44  ;;  %v1760_v37 = vunpack.c.h.b16 %v1326_v11 }
 0x100   :  { %v3085_v62 = vpop.eup %2234  ;;  %v947_v56 = vadd.f32 %v946_v9, %v945_v43  ;;  %v1086_v36 = vadd.f32 %v3081_v7, %v1085_v31  ;;  %v1768_v26 = vunpack.c.h.b16 %v1330_v47  ;;  %v955_v38 = vrot.slane %v954_v15, 2  ;;  %v3420_v47 = vld [vmem:[#allocation20_spill] sm:$0xff]  ;;  %v3421_v31 = vld [vmem:[#allocation21_spill] sm:$0xff] }
 0x101   :  { %v3088_v16 = vpop.eup %2236  ;;  %v1783_v41 = vpack.c.b16 %v1767_v3, %v1759_v54  ;;  %v1095_v1 = vadd.f32 %v3085_v62, %v1094_v14  ;;  %v1393_v53 = vpack.c.b16 %v1377_v28, %v1369_v17  ;;  %v1370_v34 = vunpack.c.h.b16 %v1215_v2 }
 0x102   :  { %v3091_v61 = vpop.eup %2238  ;;  %v948_v46 = vrot.slane %v947_v56, 1  ;;  %v1087_v4 = vadd.f32 %v3088_v16, %v1086_v36  ;;  %v1784_v12 = vpack.c.b16 %v1768_v26, %v1760_v37  ;;  %v956_v43 = vadd.f32 %v955_v38, %v954_v15 }
 0x103   :  { %1849 = vmatpush.bf16.xpose.msra.mxu2 %v1783_v41  ;;  %v1096_v9 = vadd.f32 %v3091_v61, %v1095_v1  ;;  %1582 = vmatmul.bf16.gmra.mxu0 %v1393_v53  ;;  %v1378_v11 = vunpack.c.h.b16 %v1219_v32  ;;  %v1220_v54 = vpack.c.bf16 %v3421_v31, %v3420_v47  ;;  %v1371_v17 = vunpack.c.l.b16 %v1216_v42 }
 0x104   :  { %v949_v3 = vadd.f32 %v948_v46, %v947_v56  ;;  %v1088_v25 = vrot.slane %v1087_v4, 4  ;;  %1868 = vmatpush.bf16.xpose.msra.mxu3 %v1784_v12  ;;  %v1372_v28 = vunpack.c.h.b16 %v1216_v42  ;;  %v957_v14 = vrot.slane %v956_v43, 1 }
 0x105   :  { %v1097_v0 = vrot.slane %v1096_v9, 4  ;;  %v1394_v19 = vpack.c.b16 %v1378_v11, %v1370_v34  ;;  %v1379_v36 = vunpack.c.l.b16 %v1220_v54  ;;  %v1380_v2 = vunpack.c.h.b16 %v1220_v54 }
 0x106   :  { %v1089_v37 = vadd.f32 %v1088_v25, %v1087_v4  ;;  %2240 = vrcp.f32 %v949_v3  ;;  %v1271_v15 = vmul.f32 %v2972_v52, %v3043_v22  ;;  %v958_v26 = vadd.f32 %v957_v14, %v956_v43 }
 0x107   :  { %v1098_v32 = vadd.f32 %v1097_v0, %v1096_v9  ;;  %1601 = vmatmul.bf16.gmra.mxu1 %v1394_v19  ;;  %v1395_v41 = vpack.c.b16 %v1379_v36, %v1371_v17  ;;  %v1272_v56 = vmul.f32 %v2977_v50, %v3047_v6  ;;  %v1396_v38 = vpack.c.b16 %v1380_v2, %v1372_v28 }
 0x108   :  { %v1090_v12 = vrot.slane %v1089_v37, 2  ;;  %v1279_v42 = vmul.f32 %v2979_v59, %v3043_v22  ;;  %v1280_v25 = vmul.f32 %v2983_v57, %v3047_v6  ;;  %2242 = vrcp.f32 %v958_v26 }
 0x109   :  { %v1099_v34 = vrot.slane %v1098_v32, 2  ;;  %1620 = vmatmul.bf16.gmra.mxu2 %v1395_v41  ;;  %v1318_v1 = vpack.c.bf16 %v1272_v56, %v1271_v15  ;;  %v202_v52 = vsub.f32 %v3038_v55, %v2433_v24  ;;  %1639 = vmatmul.bf16.gmra.mxu3 %v1396_v38  ;;  %v3109_v50 = vpack.c.bf16 %v3015_v27, %v3013_v33 }
 0x10a   :  { %v1091_v19 = vadd.f32 %v1090_v12, %v1089_v37  ;;  %v1322_v0 = vpack.c.bf16 %v1280_v25, %v1279_v42  ;;  %v3113_v59 = vpack.c.bf16 %v3019_v13, %v3017_v5  ;;  %v1222_v53 = vpack.c.bf16 %v2930_v10, %v2926_v8 }
 0x10b   :  { %v1100_v22 = vadd.f32 %v1099_v34, %v1098_v32  ;;  %v1743_v57 = vunpack.c.l.b16 %v1318_v1  ;;  %v1744_v6 = vunpack.c.h.b16 %v1318_v1  ;;  %v1661_v11 = vunpack.c.l.b16 %v3109_v50 }
 0x10c   :  { %v2241_v46 = vpop.eup %2240  ;;  %v1092_v4 = vrot.slane %v1091_v19, 1  ;;  %v1751_v43 = vunpack.c.l.b16 %v1322_v0  ;;  %v1752_v9 = vunpack.c.h.b16 %v1322_v0  ;;  %v1669_v33 = vunpack.c.l.b16 %v3113_v59 }
 0x10d   :  { %v1101_v47 = vrot.slane %v1100_v22, 1  ;;  %v1662_v27 = vunpack.c.h.b16 %v3109_v50  ;;  %v209_v5 = vsub.f32 %v3035_v40, %v2437_v29  ;;  %v1226_v8 = vpack.c.bf16 %v2940_v20, %v2938_v45 }
 0x10e   :  { %v1093_v13 = vadd.f32 %v1092_v4, %v1091_v19  ;;  %v1775_v31 = vpack.c.b16 %v1751_v43, %v1743_v57  ;;  %v1776_v54 = vpack.c.b16 %v1752_v9, %v1744_v6  ;;  %v2243_v10 = vpop.eup %2242  ;;  %v3124_v17 = vpack.c.b16 %v1669_v33, %v1661_v11 }
 0x10f   :  { %v1102_v3 = vadd.f32 %v1101_v47, %v1100_v22  ;;  %v1670_v28 = vunpack.c.h.b16 %v3113_v59  ;;  %v1663_v14 = vunpack.c.l.b16 %v1222_v53  ;;  %v1671_v36 = vunpack.c.l.b16 %v1226_v8 }
 0x110   :  { %2244 = vrcp.f32 %v1093_v13  ;;  %1850 = vmatpush.bf16.xpose.msra.mxu2 %v1775_v31  ;;  %1869 = vmatpush.bf16.xpose.msra.mxu3 %v1776_v54  ;;  %v1664_v37 = vunpack.c.h.b16 %v1222_v53  ;;  %v1672_v2 = vunpack.c.h.b16 %v1226_v8  ;;  %v210_v15 = vsub.f32 %v3038_v55, %v2437_v29 }
 0x111   :  { %2246 = vrcp.f32 %v1102_v3  ;;  %v217_v45 = vsub.f32 %v3035_v40, %v2439_v30  ;;  %v218_v20 = vsub.f32 %v3038_v55, %v2439_v30  ;;  %v1695_v26 = vpack.c.b16 %v1671_v36, %v1663_v14 }
 0x112   :  { %v1696_v32 = vpack.c.b16 %v1672_v2, %v1664_v37  ;;  %v225_v41 = vsub.f32 %v3035_v40, %v2452_v48  ;;  %v226_v56 = vsub.f32 %v3038_v55, %v2452_v48  ;;  %v265_v12 = vmul.f32 %v3051_v49, %v3051_v49 }
 0x113   :  { %v266_v38 = vmul.f32 %v202_v52, %v202_v52  ;;  %v273_v42 = vmul.f32 %v209_v5, %v209_v5  ;;  %v274_v25 = vmul.f32 %v210_v15, %v210_v15  ;;  %v281_v34 = vmul.f32 %v217_v45, %v217_v45 }
 0x114   :  { %v282_v1 = vmul.f32 %v218_v20, %v218_v20  ;;  %v289_v19 = vmul.f32 %v225_v41, %v225_v41  ;;  %v290_v0 = vmul.f32 %v226_v56, %v226_v56  ;;  %v329_v22 = vmul.f32 -480.5, %v265_v12 }
 0x115   :  { %v330_v57 = vmul.f32 -480.5, %v266_v38  ;;  %v337_v6 = vmul.f32 -480.5, %v273_v42  ;;  %v338_v53 = vmul.f32 -480.5, %v274_v25  ;;  %v345_v43 = vmul.f32 -480.5, %v281_v34 }
 0x116   :  { %v2245_v4 = vpop.eup %2244  ;;  %v346_v40 = vmul.f32 -480.5, %v282_v1  ;;  %v353_v9 = vmul.f32 -480.5, %v289_v19  ;;  %v354_v11 = vmul.f32 -480.5, %v290_v0  ;;  %v431_v33 = vmul.f32 1.442695, %v329_v22 }
 0x117   :  { %v2247_v55 = vpop.eup %2246  ;;  %v1197_v47 = vmul.f32 %v2245_v4, %v2241_v46  ;;  %v433_v49 = vmul.f32 1.442695, %v330_v57  ;;  %v447_v52 = vmul.f32 1.442695, %v337_v6  ;;  %v449_v13 = vmul.f32 1.442695, %v338_v53 }
 0x118   :  { %v1198_v5 = vmul.f32 %v2247_v55, %v2243_v10  ;;  %v463_v31 = vmul.f32 1.442695, %v345_v43  ;;  %v465_v54 = vmul.f32 1.442695, %v346_v40  ;;  %2248 = vpow2.f32 %v431_v33 }
 0x119   :  { %v1285_v8 = vmul.f32 %v3081_v7, %v1197_v47  ;;  %v1293_v3 = vmul.f32 %v3088_v16, %v1197_v47  ;;  %v1269_v14 = vmul.f32 %v3060_v58, %v1197_v47  ;;  %v1277_v36 = vmul.f32 %v3073_v60, %v1197_v47  ;;  %1851 = vmatmul.bf16.vlgmr.msra.gmra.mxu2 %v1695_v26 }
 0x11a   :  { %v1286_v37 = vmul.f32 %v3085_v62, %v1198_v5  ;;  %v1294_v46 = vmul.f32 %v3091_v61, %v1198_v5  ;;  %v1270_v2 = vmul.f32 %v3067_v44, %v1198_v5  ;;  %v1278_v10 = vmul.f32 %v3077_v23, %v1198_v5  ;;  %1870 = vmatmul.bf16.vlgmr.msra.gmra.mxu3 %v1696_v32 }
 0x11b   :  { %v479_v15 = vmul.f32 1.442695, %v353_v9  ;;  %v481_v45 = vmul.f32 1.442695, %v354_v11  ;;  %v587_v7 = vsub.f32 %v3041_v18, %v2433_v24  ;;  %2250 = vpow2.f32 %v433_v49 }
 0x11c   :  { %v1325_v16 = vpack.c.bf16 %v1286_v37, %v1285_v8  ;;  %v1329_v58 = vpack.c.bf16 %v1294_v46, %v1293_v3  ;;  %v1317_v20 = vpack.c.bf16 %v1270_v2, %v1269_v14  ;;  %v1321_v60 = vpack.c.bf16 %v1278_v10, %v1277_v36 }
 0x11d   :  { %v588_v62 = vsub.f32 %v3054_v21, %v2433_v24  ;;  %v595_v61 = vsub.f32 %v3041_v18, %v2437_v29  ;;  %v596_v44 = vsub.f32 %v3054_v21, %v2437_v29  ;;  %2252 = vpow2.f32 %v447_v52 }
 0x11e   :  { %v1757_v23 = vunpack.c.l.b16 %v1325_v16  ;;  %v1765_v26 = vunpack.c.l.b16 %v1329_v58  ;;  %v1758_v32 = vunpack.c.h.b16 %v1325_v16  ;;  %v1766_v41 = vunpack.c.h.b16 %v1329_v58  ;;  %v3157_v19 = vpop.eup %2248 }
 0x11f   :  { %v1741_v56 = vunpack.c.l.b16 %v1317_v20  ;;  %v1749_v12 = vunpack.c.l.b16 %v1321_v60  ;;  %v1742_v38 = vunpack.c.h.b16 %v1317_v20  ;;  %v1750_v42 = vunpack.c.h.b16 %v1321_v60 }
 0x120   :  { %v1781_v25 = vpack.c.b16 %v1765_v26, %v1757_v23  ;;  %v1782_v34 = vpack.c.b16 %v1766_v41, %v1758_v32  ;;  %v603_v1 = vsub.f32 %v3041_v18, %v2439_v30  ;;  %2254 = vpow2.f32 %v449_v13 }
 0x121   :  { %v1773_v0 = vpack.c.b16 %v1749_v12, %v1741_v56  ;;  %v1774_v22 = vpack.c.b16 %v1750_v42, %v1742_v38  ;;  %v604_v57 = vsub.f32 %v3054_v21, %v2439_v30  ;;  %2256 = vpow2.f32 %v463_v31  ;;  %v3165_v43 = vpop.eup %2250 }
 0x122   :  { %1811 = vmatpush.bf16.xpose.msra.mxu0 %v1781_v25  ;;  %1830 = vmatpush.bf16.xpose.msra.mxu1 %v1782_v34  ;;  %v611_v6 = vsub.f32 %v3041_v18, %v2452_v48  ;;  %v612_v53 = vsub.f32 %v3054_v21, %v2452_v48  ;;  %v651_v4 = vmul.f32 %v587_v7, %v587_v7  ;;  %2258 = vpow2.f32 %v465_v54 }
 0x123   :  { %v652_v40 = vmul.f32 %v588_v62, %v588_v62  ;;  %v659_v9 = vmul.f32 %v595_v61, %v595_v61  ;;  %v660_v11 = vmul.f32 %v596_v44, %v596_v44  ;;  %2260 = vpow2.f32 %v479_v15  ;;  %v3167_v13 = vpop.eup %2252 }
 0x124   :  { %v667_v55 = vmul.f32 %v603_v1, %v603_v1  ;;  %v668_v47 = vmul.f32 %v604_v57, %v604_v57  ;;  %v675_v33 = vmul.f32 %v611_v6, %v611_v6  ;;  %2262 = vpow2.f32 %v481_v45 }
 0x125   :  { %v676_v49 = vmul.f32 %v612_v53, %v612_v53  ;;  %v715_v52 = vmul.f32 -480.5, %v651_v4  ;;  %v716_v5 = vmul.f32 -480.5, %v652_v40  ;;  %v723_v18 = vmul.f32 -480.5, %v659_v9 }
 0x126   :  { %v724_v31 = vmul.f32 -480.5, %v660_v11  ;;  %v731_v21 = vmul.f32 -480.5, %v667_v55  ;;  %v732_v8 = vmul.f32 -480.5, %v668_v47  ;;  %v3169_v3 = vpop.eup %2254  ;;  %v739_v54 = vmul.f32 -480.5, %v675_v33 }
 0x127   :  { %v740_v14 = vmul.f32 -480.5, %v676_v49  ;;  %v817_v36 = vmul.f32 1.442695, %v715_v52  ;;  %v819_v37 = vmul.f32 1.442695, %v716_v5  ;;  %v3171_v46 = vpop.eup %2256  ;;  %v1694_v2 = vpack.c.b16 %v1670_v28, %v1662_v27 }
 0x128   :  { %v833_v10 = vmul.f32 1.442695, %v723_v18  ;;  %v835_v15 = vmul.f32 1.442695, %v724_v31  ;;  %v995_v45 = vadd.f32 %v3167_v13, %v3157_v19  ;;  %v3179_v7 = vpop.eup %2258  ;;  %v849_v16 = vmul.f32 1.442695, %v731_v21 }
 0x129   :  { %2264 = vpow2.f32 %v817_v36  ;;  %v851_v58 = vmul.f32 1.442695, %v732_v8  ;;  %v865_v20 = vmul.f32 1.442695, %v739_v54  ;;  %v3181_v60 = vpop.eup %2260  ;;  %v1004_v59 = vadd.f32 %v3169_v3, %v3165_v43 }
 0x12a   :  { %1812 = vmatpush.bf16.xpose.msra.mxu0 %v1773_v0  ;;  %1831 = vmatpush.bf16.xpose.msra.mxu1 %v1774_v22  ;;  %2266 = vpow2.f32 %v819_v37  ;;  %v996_v50 = vadd.f32 %v3171_v46, %v995_v45  ;;  %v143_v27 = vperm.slane %v2504_v51, 4  ;;  %v3187_v28 = vpop.eup %2262  ;;  %v867_v62 = vmul.f32 1.442695, %v740_v14 }
 0x12b   :  { %2268 = vpow2.f32 %v833_v10  ;;  %v144_v61 = vperm.slane %v2504_v51, 5  ;;  %v3191_v44 = vperm.slane %v2579_v39, 4  ;;  %v1005_v26 = vadd.f32 %v3179_v7, %v1004_v59 }
 0x12c   :  { %2270 = vpow2.f32 %v835_v15  ;;  %v997_v23 = vadd.f32 %v3181_v60, %v996_v50  ;;  %v199_v32 = vsub.f32 %v143_v27, %v2433_v24  ;;  %v207_v56 = vsub.f32 %v143_v27, %v2437_v29 }
 0x12d   :  { %2272 = vpow2.f32 %v849_v16  ;;  %v200_v41 = vsub.f32 %v144_v61, %v2433_v24  ;;  %v208_v12 = vsub.f32 %v144_v61, %v2437_v29  ;;  %v1006_v51 = vadd.f32 %v3187_v28, %v1005_v26 }
 0x12e   :  { %2274 = vpow2.f32 %v851_v58  ;;  %v998_v38 = vrot.slane %v997_v23, 4  ;;  %v215_v42 = vsub.f32 %v143_v27, %v2439_v30  ;;  %v216_v34 = vsub.f32 %v144_v61, %v2439_v30 }
 0x12f   :  { %v3201_v25 = vpop.eup %2264  ;;  %2276 = vpow2.f32 %v865_v20  ;;  %v223_v1 = vsub.f32 %v143_v27, %v2452_v48  ;;  %v224_v0 = vsub.f32 %v144_v61, %v2452_v48  ;;  %v1007_v6 = vrot.slane %v1006_v51, 4 }
 0x130   :  { %v3206_v22 = vpop.eup %2266  ;;  %2278 = vpow2.f32 %v867_v62  ;;  %v999_v57 = vadd.f32 %v998_v38, %v997_v23  ;;  %v263_v53 = vmul.f32 %v199_v32, %v199_v32  ;;  %v264_v40 = vmul.f32 %v200_v41, %v200_v41 }
 0x131   :  { %v3208_v4 = vpop.eup %2268  ;;  %1813 = vmatmul.bf16.vlgmr.msra.gmra.mxu0 %v3124_v17  ;;  %1832 = vmatmul.bf16.vlgmr.msra.gmra.mxu1 %v1694_v2  ;;  %v271_v9 = vmul.f32 %v207_v56, %v207_v56  ;;  %v272_v11 = vmul.f32 %v208_v12, %v208_v12  ;;  %v3212_v55 = vperm.slane %v2579_v39, 5  ;;  %v1008_v49 = vadd.f32 %v1007_v6, %v1006_v51 }
 0x132   :  { %v3214_v47 = vpop.eup %2270  ;;  %v1000_v33 = vrot.slane %v999_v57, 2  ;;  %v1139_v52 = vadd.f32 %v3208_v4, %v3201_v25  ;;  %v279_v5 = vmul.f32 %v215_v42, %v215_v42  ;;  %v280_v31 = vmul.f32 %v216_v34, %v216_v34 }
 0x133   :  { %v3218_v18 = vpop.eup %2272  ;;  %v1148_v17 = vadd.f32 %v3214_v47, %v3206_v22  ;;  %v287_v21 = vmul.f32 %v223_v1, %v223_v1  ;;  %v288_v8 = vmul.f32 %v224_v0, %v224_v0  ;;  %v1009_v14 = vrot.slane %v1008_v49, 2 }
 0x134   :  { %v3222_v54 = vpop.eup %2274  ;;  %v1001_v39 = vadd.f32 %v1000_v33, %v999_v57  ;;  %v1140_v36 = vadd.f32 %v3218_v18, %v1139_v52  ;;  %v327_v37 = vmul.f32 -480.5, %v263_v53  ;;  %v328_v15 = vmul.f32 -480.5, %v264_v40 }
 0x135   :  { %v3225_v2 = vpop.eup %2276  ;;  %v1149_v10 = vadd.f32 %v3222_v54, %v1148_v17  ;;  %v335_v45 = vmul.f32 -480.5, %v271_v9  ;;  %v336_v16 = vmul.f32 -480.5, %v272_v11  ;;  %v1010_v50 = vadd.f32 %v1009_v14, %v1008_v49 }
 0x136   :  { %v3228_v58 = vpop.eup %2278  ;;  %v1002_v20 = vrot.slane %v1001_v39, 1  ;;  %v1141_v59 = vadd.f32 %v3225_v2, %v1140_v36  ;;  %v343_v27 = vmul.f32 -480.5, %v279_v5  ;;  %v344_v61 = vmul.f32 -480.5, %v280_v31 }
 0x137   :  { %v1150_v62 = vadd.f32 %v3228_v58, %v1149_v10  ;;  %v351_v23 = vmul.f32 -480.5, %v287_v21  ;;  %v352_v26 = vmul.f32 -480.5, %v288_v8  ;;  %v1011_v41 = vrot.slane %v1010_v50, 1 }
 0x138   :  { %v1003_v32 = vadd.f32 %v1002_v20, %v1001_v39  ;;  %v1142_v56 = vrot.slane %v1141_v59, 4  ;;  %v427_v12 = vmul.f32 1.442695, %v327_v37  ;;  %v429_v51 = vmul.f32 1.442695, %v328_v15 }
 0x139   :  { %v1151_v38 = vrot.slane %v1150_v62, 4  ;;  %v443_v42 = vmul.f32 1.442695, %v335_v45  ;;  %v585_v34 = vsub.f32 %v3191_v44, %v2433_v24  ;;  %v1012_v1 = vadd.f32 %v1011_v41, %v1010_v50 }
 0x13a   :  { %v1143_v0 = vadd.f32 %v1142_v56, %v1141_v59  ;;  %2280 = vrcp.f32 %v1003_v32  ;;  %v445_v57 = vmul.f32 1.442695, %v336_v16  ;;  %v459_v53 = vmul.f32 1.442695, %v343_v27 }
 0x13b   :  { %v1152_v6 = vadd.f32 %v1151_v38, %v1150_v62  ;;  %2282 = vpow2.f32 %v427_v12  ;;  %v461_v40 = vmul.f32 1.442695, %v344_v61  ;;  %v475_v11 = vmul.f32 1.442695, %v351_v23 }
 0x13c   :  { %v1144_v9 = vrot.slane %v1143_v0, 2  ;;  %2284 = vrcp.f32 %v1012_v1  ;;  %v477_v33 = vmul.f32 1.442695, %v352_v26  ;;  %v586_v52 = vsub.f32 %v3212_v55, %v2433_v24 }
 0x13d   :  { %v1153_v49 = vrot.slane %v1152_v6, 2  ;;  %2286 = vpow2.f32 %v429_v51  ;;  %v593_v5 = vsub.f32 %v3191_v44, %v2437_v29  ;;  %v594_v31 = vsub.f32 %v3212_v55, %v2437_v29 }
 0x13e   :  { %v1145_v17 = vadd.f32 %v1144_v9, %v1143_v0  ;;  %2288 = vpow2.f32 %v443_v42  ;;  %v601_v21 = vsub.f32 %v3191_v44, %v2439_v30  ;;  %v602_v39 = vsub.f32 %v3212_v55, %v2439_v30 }
 0x13f   :  { %v1154_v8 = vadd.f32 %v1153_v49, %v1152_v6  ;;  %2290 = vpow2.f32 %v445_v57  ;;  %v609_v14 = vsub.f32 %v3191_v44, %v2452_v48  ;;  %v610_v37 = vsub.f32 %v3212_v55, %v2452_v48 }
 0x140   :  { %v2281_v24 = vpop.eup %2280  ;;  %v1146_v36 = vrot.slane %v1145_v17, 1  ;;  %2292 = vpow2.f32 %v459_v53  ;;  %v649_v10 = vmul.f32 %v585_v34, %v585_v34  ;;  %v650_v45 = vmul.f32 %v586_v52, %v586_v52 }
 0x141   :  { %v3248_v15 = vpop.eup %2282  ;;  %v1155_v29 = vrot.slane %v1154_v8, 1  ;;  %2294 = vpow2.f32 %v461_v40  ;;  %v657_v16 = vmul.f32 %v593_v5, %v593_v5  ;;  %v658_v30 = vmul.f32 %v594_v31, %v594_v31 }
 0x142   :  { %v2285_v20 = vpop.eup %2284  ;;  %v1147_v50 = vadd.f32 %v1146_v36, %v1145_v17  ;;  %2296 = vpow2.f32 %v475_v11  ;;  %v665_v59 = vmul.f32 %v601_v21, %v601_v21  ;;  %v666_v62 = vmul.f32 %v602_v39, %v602_v39 }
 0x143   :  { %v3250_v27 = vpop.eup %2286  ;;  %v1156_v44 = vadd.f32 %v1155_v29, %v1154_v8  ;;  %2298 = vpow2.f32 %v477_v33  ;;  %v673_v61 = vmul.f32 %v609_v14, %v609_v14  ;;  %v674_v48 = vmul.f32 %v610_v37, %v610_v37 }
 0x144   :  { %v3252_v23 = vpop.eup %2288  ;;  %2300 = vrcp.f32 %v1147_v50  ;;  %v713_v55 = vmul.f32 -480.5, %v649_v10  ;;  %v714_v26 = vmul.f32 -480.5, %v650_v45  ;;  %v721_v41 = vmul.f32 -480.5, %v657_v16 }
 0x145   :  { %v3254_v32 = vpop.eup %2290  ;;  %2302 = vrcp.f32 %v1156_v44  ;;  %v722_v56 = vmul.f32 -480.5, %v658_v30  ;;  %v729_v12 = vmul.f32 -480.5, %v665_v59  ;;  %v730_v51 = vmul.f32 -480.5, %v666_v62  ;;  %v3422_v59 = vld [vmem:[#allocation15_spill] sm:$0xff]  ;;  %v3423_v44 = vld [vmem:[#allocation16_spill] sm:$0xff] }
 0x146   :  { %v3256_v38 = vpop.eup %2292  ;;  %v737_v42 = vmul.f32 -480.5, %v673_v61  ;;  %v738_v34 = vmul.f32 -480.5, %v674_v48  ;;  %v813_v1 = vmul.f32 1.442695, %v713_v55  ;;  %v815_v57 = vmul.f32 1.442695, %v714_v26 }
 0x147   :  { %v3258_v0 = vpop.eup %2294  ;;  %v829_v6 = vmul.f32 1.442695, %v721_v41  ;;  %v831_v53 = vmul.f32 1.442695, %v722_v56  ;;  %v977_v40 = vadd.f32 %v3252_v23, %v3248_v15  ;;  %v845_v11 = vmul.f32 1.442695, %v729_v12 }
 0x148   :  { %v3262_v9 = vpop.eup %2296  ;;  %2304 = vpow2.f32 %v813_v1  ;;  %v847_v49 = vmul.f32 1.442695, %v730_v51  ;;  %v986_v5 = vadd.f32 %v3254_v32, %v3250_v27  ;;  %v861_v31 = vmul.f32 1.442695, %v737_v42  ;;  %v3424_v26 = vld [vmem:[#allocation11_spill] sm:$0xff] }
 0x149   :  { %v3264_v33 = vpop.eup %2298  ;;  %2306 = vpow2.f32 %v815_v57  ;;  %v978_v52 = vadd.f32 %v3256_v38, %v977_v40  ;;  %v863_v21 = vmul.f32 1.442695, %v738_v34  ;;  %v1233_v62 = vpack.c.bf16 %v3423_v44, %v3422_v59 }
 0x14a   :  { %v2301_v17 = vpop.eup %2300  ;;  %2308 = vpow2.f32 %v829_v6  ;;  %v987_v36 = vadd.f32 %v3258_v0, %v986_v5 }
 0x14b   :  { %v2303_v8 = vpop.eup %2302  ;;  %v3269_v39 = vmul.f32 %v2301_v17, %v2281_v24  ;;  %2310 = vpow2.f32 %v831_v53  ;;  %v979_v14 = vadd.f32 %v3262_v9, %v978_v52  ;;  %v1685_v34 = vunpack.c.l.b16 %v1233_v62 }
 0x14c   :  { %v3273_v37 = vmul.f32 %v2303_v8, %v2285_v20  ;;  %2312 = vpow2.f32 %v845_v11  ;;  %v988_v20 = vadd.f32 %v3264_v33, %v987_v36 }
 0x14d   :  { %v1291_v10 = vmul.f32 %v3218_v18, %v3269_v39  ;;  %v1299_v29 = vmul.f32 %v3225_v2, %v3269_v39  ;;  %2314 = vpow2.f32 %v847_v49  ;;  %v980_v45 = vrot.slane %v979_v14, 4 }
 0x14e   :  { %v3279_v16 = vpop.eup %2304  ;;  %v1292_v24 = vmul.f32 %v3222_v54, %v3273_v37  ;;  %v1300_v50 = vmul.f32 %v3228_v58, %v3273_v37  ;;  %2316 = vpow2.f32 %v861_v31  ;;  %v1229_v2 = vpack.c.bf16 %v3023_v35, %v3021_v63  ;;  %v3425_v58 = vld [vmem:[#allocation12_spill] sm:$0xff] }
 0x14f   :  { %v3286_v30 = vpop.eup %2306  ;;  %2318 = vpow2.f32 %v863_v21  ;;  %v981_v18 = vadd.f32 %v980_v45, %v979_v14  ;;  %v989_v55 = vrot.slane %v988_v20, 4  ;;  %v1230_v41 = vpack.c.bf16 %v3425_v58, %v3424_v26 }
 0x150   :  { %v3292_v61 = vpop.eup %2308  ;;  %v1328_v48 = vpack.c.bf16 %v1292_v24, %v1291_v10  ;;  %v1332_v54 = vpack.c.bf16 %v1300_v50, %v1299_v29  ;;  %v1677_v42 = vunpack.c.l.b16 %v1229_v2  ;;  %v1678_v29 = vunpack.c.h.b16 %v1229_v2 }
 0x151   :  { %v3296_v56 = vpop.eup %2310  ;;  %v982_v12 = vrot.slane %v981_v18, 2  ;;  %v1121_v51 = vadd.f32 %v3292_v61, %v3279_v16  ;;  %v990_v57 = vadd.f32 %v989_v55, %v988_v20  ;;  %v1686_v50 = vunpack.c.h.b16 %v1233_v62  ;;  %v3426_v20 = vld [vmem:[#allocation13_spill] sm:$0xff] }
 0x152   :  { %v3300_v63 = vpop.eup %2312  ;;  %v1763_v35 = vunpack.c.l.b16 %v1328_v48  ;;  %v1771_v1 = vunpack.c.l.b16 %v1332_v54  ;;  %v1130_v6 = vadd.f32 %v3296_v56, %v3286_v30  ;;  %v1764_v49 = vunpack.c.h.b16 %v1328_v48 }
 0x153   :  { %v3304_v53 = vpop.eup %2314  ;;  %v983_v40 = vadd.f32 %v982_v12, %v981_v18  ;;  %v1122_v11 = vadd.f32 %v3300_v63, %v1121_v51  ;;  %v1772_v52 = vunpack.c.h.b16 %v1332_v54  ;;  %v991_v31 = vrot.slane %v990_v57, 2  ;;  %v3427_v18 = vld [vmem:[#allocation14_spill] sm:$0xff] }
 0x154   :  { %v3307_v5 = vpop.eup %2316  ;;  %v1787_v17 = vpack.c.b16 %v1771_v1, %v1763_v35  ;;  %v1131_v21 = vadd.f32 %v3304_v53, %v1130_v6  ;;  %v1701_v8 = vpack.c.b16 %v1685_v34, %v1677_v42  ;;  %v1234_v59 = vpack.c.bf16 %v3427_v18, %v3426_v20 }
 0x155   :  { %v3310_v14 = vpop.eup %2318  ;;  %v1123_v36 = vadd.f32 %v3307_v5, %v1122_v11  ;;  %v1788_v10 = vpack.c.b16 %v1772_v52, %v1764_v49  ;;  %v992_v45 = vadd.f32 %v991_v31, %v990_v57  ;;  %v1679_v48 = vunpack.c.l.b16 %v1230_v41 }
 0x156   :  { %1925 = vmatpush.bf16.xpose.msrb.mxu2 %v1787_v17  ;;  %v1132_v24 = vadd.f32 %v3310_v14, %v1131_v21  ;;  %1818 = vmatmul.bf16.gmra.mxu0 %v1701_v8  ;;  %v1680_v54 = vunpack.c.h.b16 %v1230_v41  ;;  %v984_v55 = vrot.slane %v983_v40, 1  ;;  %v1702_v58 = vpack.c.b16 %v1686_v50, %v1678_v29 }
 0x157   :  { %v1124_v44 = vrot.slane %v1123_v36, 4  ;;  %1944 = vmatpush.bf16.xpose.msrb.mxu3 %v1788_v10  ;;  %v1687_v12 = vunpack.c.l.b16 %v1234_v59  ;;  %v1688_v42 = vunpack.c.h.b16 %v1234_v59  ;;  %v1275_v2 = vmul.f32 %v3201_v25, %v3269_v39 }
 0x158   :  { %v1133_v26 = vrot.slane %v1132_v24, 4  ;;  %v993_v34 = vrot.slane %v992_v45, 1  ;;  %1837 = vmatmul.bf16.gmra.mxu1 %v1702_v58  ;;  %v1276_v1 = vmul.f32 %v3206_v22, %v3273_v37  ;;  %v1283_v41 = vmul.f32 %v3208_v4, %v3269_v39 }
 0x159   :  { %v1125_v51 = vadd.f32 %v1124_v44, %v1123_v36  ;;  %v1703_v62 = vpack.c.b16 %v1687_v12, %v1679_v48  ;;  %v1704_v6 = vpack.c.b16 %v1688_v42, %v1680_v54  ;;  %v1284_v11 = vmul.f32 %v3214_v47, %v3273_v37 }
 0x15a   :  { %v1134_v35 = vadd.f32 %v1133_v26, %v1132_v24  ;;  %v985_v49 = vadd.f32 %v984_v55, %v983_v40  ;;  %v1320_v17 = vpack.c.bf16 %v1276_v1, %v1275_v2  ;;  %v994_v21 = vadd.f32 %v993_v34, %v992_v45 }
 0x15b   :  { %v1126_v57 = vrot.slane %v1125_v51, 2  ;;  %1856 = vmatmul.bf16.gmra.mxu2 %v1703_v62  ;;  %1875 = vmatmul.bf16.gmra.mxu3 %v1704_v6  ;;  %v1324_v31 = vpack.c.bf16 %v1284_v11, %v1283_v41  ;;  %v1224_v4 = vpack.c.bf16 %v3165_v43, %v3157_v19  ;;  %v1228_v40 = vpack.c.bf16 %v3169_v3, %v3167_v13 }
 0x15c   :  { %v1135_v52 = vrot.slane %v1134_v35, 2  ;;  %v1747_v36 = vunpack.c.l.b16 %v1320_v17  ;;  %v1748_v10 = vunpack.c.h.b16 %v1320_v17  ;;  %2320 = vrcp.f32 %v985_v49 }
 0x15d   :  { %v1127_v25 = vadd.f32 %v1126_v57, %v1125_v51  ;;  %v1755_v29 = vunpack.c.l.b16 %v1324_v31  ;;  %v1756_v24 = vunpack.c.h.b16 %v1324_v31  ;;  %2322 = vrcp.f32 %v994_v21  ;;  %v1540_v31 = vpop.f32.mrf.mxu2  ;;  %v1559_v21 = vpop.f32.mrf.mxu3 }
 0x15e   :  { %v1136_v8 = vadd.f32 %v1135_v52, %v1134_v35  ;;  %v1667_v45 = vunpack.c.l.b16 %v1224_v4  ;;  %v1675_v18 = vunpack.c.l.b16 %v1228_v40  ;;  %v3330_v59 = vpack.c.bf16 %v3258_v0, %v3256_v38  ;;  %v1521_v52 = vpop.f32.mrf.mxu1 }
 0x15f   :  { %v1128_v22 = vrot.slane %v1127_v25, 1  ;;  %v1779_v39 = vpack.c.b16 %v1755_v29, %v1747_v36  ;;  %v1780_v37 = vpack.c.b16 %v1756_v24, %v1748_v10  ;;  %v1668_v44 = vunpack.c.h.b16 %v1224_v4 }
 0x160   :  { %v1137_v50 = vrot.slane %v1136_v8, 1  ;;  %v1676_v19 = vunpack.c.h.b16 %v1228_v40  ;;  %v1699_v54 = vpack.c.b16 %v1675_v18, %v1667_v45  ;;  %v1236_v62 = vpack.c.bf16 %v3187_v28, %v3181_v60 }
 0x161   :  { %v1129_v47 = vadd.f32 %v1128_v22, %v1127_v25  ;;  %1926 = vmatpush.bf16.xpose.msrb.mxu2 %v1779_v39  ;;  %1945 = vmatpush.bf16.xpose.msrb.mxu3 %v1780_v37  ;;  %v1227_v36 = vpack.c.bf16 %v3254_v32, %v3252_v23 }
 0x162   :  { %v1138_v20 = vadd.f32 %v1137_v50, %v1136_v8  ;;  %v2321_v43 = vpop.eup %2320  ;;  %v1700_v26 = vpack.c.b16 %v1676_v19, %v1668_v44  ;;  %v1691_v49 = vunpack.c.l.b16 %v1236_v62  ;;  %v2408_v50 = vmov 0.0  }
 0x163   :  { %2324 = vrcp.f32 %v1129_v47  ;;  %v2323_v48 = vpop.eup %2322  ;;  %58 = vst.msk [vmem:[#allocation7] sm:$0xff] %vm57_vm14, %v2408_v50  ;;  %v1673_v47 = vunpack.c.l.b16 %v1227_v36  ;;  %v1674_v37 = vunpack.c.h.b16 %v1227_v36 }
 0x164   :  { %2326 = vrcp.f32 %v1138_v20  ;;  %59 = vst.msk [vmem:[#allocation7 + $0x8] sm:$0xff] %vm57_vm14, %v2408_v50 }
 0x165   :  { %60 = vst.msk [vmem:[#allocation7 + $0x10] sm:$0xff] %vm57_vm14, %v2408_v50  ;;  %v1561_v23 = vpop.f32.mrf.mxu3 }
 0x166   :  { %61 = vst.msk [vmem:[#allocation7 + $0x18] sm:$0xff] %vm57_vm14, %v2408_v50 }
 0x167   :  { %62 = vst.msk [vmem:[#allocation7 + $0x20] sm:$0xff] %vm57_vm14, %v2408_v50 }
 0x168   :  { %63 = vst.msk [vmem:[#allocation7 + $0x28] sm:$0xff] %vm57_vm14, %v2408_v50 }
 0x169   :  { %v2325_v55 = vpop.eup %2324  ;;  %64 = vst.msk [vmem:[#allocation7 + $0x30] sm:$0xff] %vm57_vm14, %v2408_v50 }
 0x16a   :  { %v2327_v13 = vpop.eup %2326  ;;  %v1201_v3 = vmul.f32 %v2325_v55, %v2321_v43  ;;  %65 = vst.msk [vmem:[#allocation7 + $0x38] sm:$0xff] %vm57_vm14, %v2408_v50  ;;  %v1235_v43 = vpack.c.bf16 %v3264_v33, %v3262_v9  ;;  %v1682_v55 = vunpack.c.h.b16 %v3330_v59 }
 0x16b   :  { %v1202_v58 = vmul.f32 %v2327_v13, %v2323_v48  ;;  %1927 = vmatmul.bf16.vlgmr.msrb.gmra.mxu2 %v1699_v54  ;;  %1946 = vmatmul.bf16.vlgmr.msrb.gmra.mxu3 %v1700_v26  ;;  %v1681_v48 = vunpack.c.l.b16 %v3330_v59 }
 0x16c   :  { %v1289_v12 = vmul.f32 %v3300_v63, %v1201_v3  ;;  %v1297_v51 = vmul.f32 %v3307_v5, %v1201_v3  ;;  %v1273_v42 = vmul.f32 %v3279_v16, %v1201_v3  ;;  %v1281_v2 = vmul.f32 %v3292_v61, %v1201_v3  ;;  %v1959_v50 = vld [vmem:[#allocation7 + $0x10] sm:$0xff] }
 0x16d   :  { %v1290_v38 = vmul.f32 %v3304_v53, %v1202_v58  ;;  %v1298_v0 = vmul.f32 %v3310_v14, %v1202_v58  ;;  %v1274_v34 = vmul.f32 %v3286_v30, %v1202_v58  ;;  %v1282_v35 = vmul.f32 %v3296_v56, %v1202_v58  ;;  %v1502_v56 = vpop.f32.mrf.mxu0  ;;  %v1564_v19 = vpop.f32.mrf.mxu3 }
 0x16e   :  { %v1232_v16 = vpack.c.bf16 %v3179_v7, %v3171_v46  ;;  %v1692_v46 = vunpack.c.h.b16 %v1236_v62  ;;  %v1223_v7 = vpack.c.bf16 %v3250_v27, %v3248_v15  ;;  %v1523_v15 = vpop.f32.mrf.mxu1  ;;  %v1542_v27 = vpop.f32.mrf.mxu2  ;;  %v1689_v54 = vunpack.c.l.b16 %v1235_v43 }
 0x16f   :  { %v1327_v63 = vpack.c.bf16 %v1290_v38, %v1289_v12  ;;  %v1331_v1 = vpack.c.bf16 %v1298_v0, %v1297_v51  ;;  %v1319_v5 = vpack.c.bf16 %v1274_v34, %v1273_v42  ;;  %v1323_v57 = vpack.c.bf16 %v1282_v35, %v1281_v2 }
 0x170   :  { %v1683_v30 = vunpack.c.l.b16 %v1232_v16  ;;  %v1684_v8 = vunpack.c.h.b16 %v1232_v16  ;;  %v1665_v4 = vunpack.c.l.b16 %v1223_v7  ;;  %v1666_v39 = vunpack.c.h.b16 %v1223_v7 }
 0x171   :  { %v1761_v61 = vunpack.c.l.b16 %v1327_v63  ;;  %v1769_v6 = vunpack.c.l.b16 %v1331_v1  ;;  %v1762_v53 = vunpack.c.h.b16 %v1327_v63  ;;  %v1770_v41 = vunpack.c.h.b16 %v1331_v1 }
 0x172   :  { %v1745_v60 = vunpack.c.l.b16 %v1319_v5  ;;  %v1753_v28 = vunpack.c.l.b16 %v1323_v57  ;;  %v1746_v17 = vunpack.c.h.b16 %v1319_v5  ;;  %v1754_v25 = vunpack.c.h.b16 %v1323_v57  ;;  %v1957_v57 = vld [vmem:[#allocation7] sm:$0xff] }
 0x173   :  { %v1785_v14 = vpack.c.b16 %v1769_v6, %v1761_v61  ;;  %v1786_v11 = vpack.c.b16 %v1770_v41, %v1762_v53  ;;  %v1707_v10 = vpack.c.b16 %v1691_v49, %v1683_v30  ;;  %v1708_v24 = vpack.c.b16 %v1692_v46, %v1684_v8 }
 0x174   :  { %v1777_v22 = vpack.c.b16 %v1753_v28, %v1745_v60  ;;  %v1778_v29 = vpack.c.b16 %v1754_v25, %v1746_v17  ;;  %v1697_v32 = vpack.c.b16 %v1673_v47, %v1665_v4  ;;  %v1698_v20 = vpack.c.b16 %v1674_v37, %v1666_v39  ;;  %v1958_v28 = vld [vmem:[#allocation7 + $0x8] sm:$0xff] }
 0x175   :  { %1887 = vmatpush.bf16.xpose.msrb.mxu0 %v1785_v14  ;;  %1906 = vmatpush.bf16.xpose.msrb.mxu1 %v1786_v11  ;;  %v1504_v40 = vpop.f32.mrf.mxu0  ;;  %v1690_v26 = vunpack.c.h.b16 %v1235_v43  ;;  %v1522_v58 = vadd.f32 %v1521_v52, %v1502_v56  ;;  %v1566_v51 = vpop.f32.mrf.mxu3  ;;  %v1705_v2 = vpack.c.b16 %v1689_v54, %v1681_v48 }
 0x176   :  { %v1526_v18 = vpop.f32.mrf.mxu1  ;;  %v1545_v44 = vpop.f32.mrf.mxu2  ;;  %v1524_v9 = vadd.f32 %v1523_v15, %v1504_v40 }
 0x177   :  { %v1541_v42 = vadd.f32 %v1540_v31, %v1522_v58  ;;  %v1706_v38 = vpack.c.b16 %v1690_v26, %v1682_v55 }
 0x178   :  { %v1543_v1 = vadd.f32 %v1542_v27, %v1524_v9 }
 0x179   :  { %v1560_v0 = vadd.f32 %v1559_v21, %v1541_v42 }
 0x17a   :  { %v1562_v16 = vadd.f32 %v1561_v23, %v1543_v1 }
 0x17b   :  { %1932 = vmatmul.bf16.gmra.mxu2 %v1707_v10  ;;  %1951 = vmatmul.bf16.gmra.mxu3 %v1708_v24 }
 0x17d   :  { %1888 = vmatpush.bf16.xpose.msrb.mxu0 %v1777_v22  ;;  %1907 = vmatpush.bf16.xpose.msrb.mxu1 %v1778_v29  ;;  %v1507_v45 = vpop.f32.mrf.mxu0  ;;  %v1635_v63 = vpop.f32.mrf.mxu3 }
 0x17e   :  { %v1528_v3 = vpop.f32.mrf.mxu1  ;;  %v1547_v12 = vpop.f32.mrf.mxu2  ;;  %v1527_v41 = vadd.f32 %v1526_v18, %v1507_v45  ;;  %v1960_v45 = vld [vmem:[#allocation7 + $0x18] sm:$0xff] }
 0x180   :  { %v1546_v56 = vadd.f32 %v1545_v44, %v1527_v41  ;;  %v1961_v41 = vld [vmem:[#allocation7 + $0x20] sm:$0xff] }
 0x182   :  { %v1565_v17 = vadd.f32 %v1564_v19, %v1546_v56 }
 0x184   :  { %1889 = vmatmul.bf16.vlgmr.msrb.gmra.mxu0 %v1697_v32  ;;  %1908 = vmatmul.bf16.vlgmr.msrb.gmra.mxu1 %v1698_v20 }
 0x185   :  { %v1509_v13 = vpop.f32.mrf.mxu0  ;;  %v1637_v49 = vpop.f32.mrf.mxu3 }
 0x186   :  { %v1597_v35 = vpop.f32.mrf.mxu1  ;;  %v1616_v62 = vpop.f32.mrf.mxu2  ;;  %v1529_v8 = vadd.f32 %v1528_v3, %v1509_v13 }
 0x188   :  { %v1548_v10 = vadd.f32 %v1547_v12, %v1529_v8 }
 0x18a   :  { %v1567_v4 = vadd.f32 %v1566_v51, %v1548_v10 }
 0x18d   :  { %v1578_v34 = vpop.f32.mrf.mxu0  ;;  %v1640_v29 = vpop.f32.mrf.mxu3 }
 0x18e   :  { %v1579_v33 = vadd.f32 %v1578_v34, %v1560_v0  ;;  %v1599_v53 = vpop.f32.mrf.mxu1  ;;  %v1618_v30 = vpop.f32.mrf.mxu2 }
 0x190   :  { %v1598_v59 = vadd.f32 %v1597_v35, %v1579_v33 }
 0x192   :  { %v1617_v5 = vadd.f32 %v1616_v62, %v1598_v59 }
 0x194   :  { %1894 = vmatmul.bf16.gmra.mxu0 %v1705_v2  ;;  %1913 = vmatmul.bf16.gmra.mxu1 %v1706_v38  ;;  %v1636_v61 = vadd.f32 %v1635_v63, %v1617_v5 }
 0x195   :  { %v1580_v6 = vpop.f32.mrf.mxu0  ;;  %v1642_v20 = vpop.f32.mrf.mxu3 }
 0x196   :  { %v1965_v14 = vadd.f32 %v1957_v57, %v1636_v61  ;;  %v1581_v11 = vadd.f32 %v1580_v6, %v1562_v16  ;;  %v1602_v21 = vpop.f32.mrf.mxu1  ;;  %v1621_v36 = vpop.f32.mrf.mxu2 }
 0x198   :  { %1974 = vst.msk [vmem:[#allocation7] sm:$0xff] %vm57_vm14, %v1965_v14  ;;  %v1600_v52 = vadd.f32 %v1599_v53, %v1581_v11 }
 0x19a   :  { %v1619_v60 = vadd.f32 %v1618_v30, %v1600_v52 }
 0x19c   :  { %v1638_v25 = vadd.f32 %v1637_v49, %v1619_v60 }
 0x19d   :  { %v1583_v31 = vpop.f32.mrf.mxu0  ;;  %v1871_v43 = vpop.f32.mrf.mxu3 }
 0x19e   :  { %v1966_v46 = vadd.f32 %v1958_v28, %v1638_v25  ;;  %v1584_v7 = vadd.f32 %v1583_v31, %v1565_v17  ;;  %v1604_v15 = vpop.f32.mrf.mxu1  ;;  %v1623_v27 = vpop.f32.mrf.mxu2 }
 0x1a0   :  { %1975 = vst.msk [vmem:[#allocation7 + $0x8] sm:$0xff] %vm57_vm14, %v1966_v46  ;;  %v1603_v22 = vadd.f32 %v1602_v21, %v1584_v7  ;;  %v1962_v21 = vld [vmem:[#allocation7 + $0x28] sm:$0xff] }
 0x1a2   :  { %v1622_v24 = vadd.f32 %v1621_v36, %v1603_v22 }
 0x1a4   :  { %v1641_v47 = vadd.f32 %v1640_v29, %v1622_v24 }
 0x1a5   :  { %v1585_v39 = vpop.f32.mrf.mxu0  ;;  %v1873_v26 = vpop.f32.mrf.mxu3 }
 0x1a6   :  { %v1967_v37 = vadd.f32 %v1959_v50, %v1641_v47  ;;  %v1586_v40 = vadd.f32 %v1585_v39, %v1567_v4  ;;  %v1852_v19 = vpop.f32.mrf.mxu2 }
 0x1a8   :  { %1976 = vst.msk [vmem:[#allocation7 + $0x10] sm:$0xff] %vm57_vm14, %v1967_v37  ;;  %v1605_v23 = vadd.f32 %v1604_v15, %v1586_v40  ;;  %v1963_v37 = vld [vmem:[#allocation7 + $0x30] sm:$0xff] }
 0x1aa   :  { %v1624_v32 = vadd.f32 %v1623_v27, %v1605_v23 }
 0x1ac   :  { %v1643_v18 = vadd.f32 %v1642_v20, %v1624_v32 }
 0x1ae   :  { %v1968_v44 = vadd.f32 %v1960_v45, %v1643_v18  ;;  %v1814_v48 = vpop.f32.mrf.mxu0  ;;  %v1833_v54 = vpop.f32.mrf.mxu1 }
 0x1af   :  { %v1854_v55 = vpop.f32.mrf.mxu2  ;;  %v1834_v35 = vadd.f32 %v1833_v54, %v1814_v48 }
 0x1b0   :  { %1977 = vst.msk [vmem:[#allocation7 + $0x18] sm:$0xff] %vm57_vm14, %v1968_v44 }
 0x1b1   :  { %v1853_v9 = vadd.f32 %v1852_v19, %v1834_v35 }
 0x1b3   :  { %v1872_v62 = vadd.f32 %v1871_v43, %v1853_v9  ;;  %v1964_v43 = vld [vmem:[#allocation7 + $0x38] sm:$0xff] }
 0x1b6   :  { %v1816_v13 = vpop.f32.mrf.mxu0  ;;  %v1835_v3 = vpop.f32.mrf.mxu1 }
 0x1b7   :  { %v1836_v5 = vadd.f32 %v1835_v3, %v1816_v13 }
 0x1b9   :  { %v1855_v16 = vadd.f32 %v1854_v55, %v1836_v5 }
 0x1bb   :  { %v1874_v14 = vadd.f32 %v1873_v26, %v1855_v16 }
 0x1d3   :  { %v1819_v51 = vpop.f32.mrf.mxu0 }
 0x1d5   :  { %v1838_v42 = vpop.f32.mrf.mxu1 }
 0x1d6   :  { %v1839_v56 = vadd.f32 %v1838_v42, %v1819_v51 }
 0x1db   :  { %v1821_v0 = vpop.f32.mrf.mxu0 }
 0x1dd   :  { %v1840_v34 = vpop.f32.mrf.mxu1 }
 0x1de   :  { %v1857_v58 = vpop.f32.mrf.mxu2  ;;  %v1876_v12 = vpop.f32.mrf.mxu3  ;;  %v1841_v22 = vadd.f32 %v1840_v34, %v1821_v0 }
 0x1df   :  { %v1858_v17 = vadd.f32 %v1857_v58, %v1839_v56 }
 0x1e1   :  { %v1877_v8 = vadd.f32 %v1876_v12, %v1858_v17 }
 0x1e6   :  { %v1859_v2 = vpop.f32.mrf.mxu2  ;;  %v1878_v38 = vpop.f32.mrf.mxu3 }
 0x1e7   :  { %v1860_v50 = vadd.f32 %v1859_v2, %v1841_v22 }
 0x1e9   :  { %v1879_v40 = vadd.f32 %v1878_v38, %v1860_v50 }
 0x1ee   :  { %v1928_v33 = vpop.f32.mrf.mxu2  ;;  %v1947_v63 = vpop.f32.mrf.mxu3 }
 0x1f6   :  { %v1930_v53 = vpop.f32.mrf.mxu2  ;;  %v1949_v28 = vpop.f32.mrf.mxu3 }
 0x1fe   :  { %v1933_v7 = vpop.f32.mrf.mxu2  ;;  %v1952_v47 = vpop.f32.mrf.mxu3 }
 0x201   :  { %v1890_v1 = vpop.f32.mrf.mxu0  ;;  %v1909_v59 = vpop.f32.mrf.mxu1 }
 0x202   :  { %v1891_v57 = vadd.f32 %v1890_v1, %v1872_v62 }
 0x204   :  { %v1910_v61 = vadd.f32 %v1909_v59, %v1891_v57 }
 0x206   :  { %v1929_v6 = vadd.f32 %v1928_v33, %v1910_v61  ;;  %v1935_v45 = vpop.f32.mrf.mxu2  ;;  %v1954_v19 = vpop.f32.mrf.mxu3 }
 0x208   :  { %v1948_v11 = vadd.f32 %v1947_v63, %v1929_v6 }
 0x209   :  { %v1892_v30 = vpop.f32.mrf.mxu0  ;;  %v1911_v49 = vpop.f32.mrf.mxu1 }
 0x20a   :  { %v1969_v52 = vadd.f32 %v1961_v41, %v1948_v11  ;;  %v1893_v60 = vadd.f32 %v1892_v30, %v1874_v14 }
 0x20c   :  { %1978 = vst.msk [vmem:[#allocation7 + $0x20] sm:$0xff] %vm57_vm14, %v1969_v52  ;;  %v1912_v25 = vadd.f32 %v1911_v49, %v1893_v60 }
 0x20e   :  { %v1931_v31 = vadd.f32 %v1930_v53, %v1912_v25 }
 0x210   :  { %v1950_v46 = vadd.f32 %v1949_v28, %v1931_v31 }
 0x211   :  { %v1895_v36 = vpop.f32.mrf.mxu0  ;;  %v1914_v10 = vpop.f32.mrf.mxu1 }
 0x212   :  { %v1970_v29 = vadd.f32 %v1962_v21, %v1950_v46  ;;  %v1896_v24 = vadd.f32 %v1895_v36, %v1877_v8 }
 0x214   :  { %1979 = vst.msk [vmem:[#allocation7 + $0x28] sm:$0xff] %vm57_vm14, %v1970_v29  ;;  %v1915_v4 = vadd.f32 %v1914_v10, %v1896_v24 }
 0x216   :  { %v1934_v39 = vadd.f32 %v1933_v7, %v1915_v4 }
 0x218   :  { %v1953_v15 = vadd.f32 %v1952_v47, %v1934_v39 }
 0x219   :  { %v1897_v27 = vpop.f32.mrf.mxu0  ;;  %v1916_v20 = vpop.f32.mrf.mxu1 }
 0x21a   :  { %v1971_v23 = vadd.f32 %v1963_v37, %v1953_v15  ;;  %v1898_v32 = vadd.f32 %v1897_v27, %v1879_v40 }
 0x21c   :  { %1980 = vst.msk [vmem:[#allocation7 + $0x30] sm:$0xff] %vm57_vm14, %v1971_v23  ;;  %v1917_v18 = vadd.f32 %v1916_v20, %v1898_v32 }
 0x21e   :  { %v1936_v44 = vadd.f32 %v1935_v45, %v1917_v18 }
 0x220   :  { %v1955_v48 = vadd.f32 %v1954_v19, %v1936_v44 }
 0x222   :  { %v1972_v54 = vadd.f32 %v1964_v43, %v1955_v48 }
 0x224   :  { %1981 = vst.msk [vmem:[#allocation7 + $0x38] sm:$0xff] %vm57_vm14, %v1972_v54 }
 0x225   :  { %1994 = dma.vmem_to_hbm [thread:$0]  %s1987_s1, 1024, %s1989_s21, [#allocation4], %s2410_s22, %s2410_s22, %s2411_s23  }
 0x226   :  { %2404 = dma.done.wait [#allocation4], 1024  }
 0x227   :  { %2405 = vsyncadd [#allocation4], 4294966272 }
 0x228   :  { %1999 = vsyncpa [#allocation3], 1 }
 0x229   :  { %2000 = vsyncpa [#allocation6], 1 }
 0x22a   :  { %2001 = vsyncpa [#allocation4], 1 }

</bundles_post_ra>
